<compile_context>
chip_gen: v6e
topology: v6e:2x2x1
jax: 0.10.0
libtpu: 0.0.40
codegen_flags: <defaults>
</compile_context>

<pallas_src>
import functools

import jax
import jax.numpy as jnp
from jax import lax
from jax.experimental import pallas as pl
from jax.experimental.pallas import tpu as pltpu

_SUBLANES_F32 = 8     # f32 sublane multiple for batch padding
_OUT_PAD = 128        # lane-dense padded width for the fc output


def _lstm_kernel(x_ref, wih0_ref, whh0_ref, w1_ref, b0_ref, b1_ref,
                 fcw_ref, fcb_ref, out_ref, xw0_ref, *, seq_len, batch):
    """2-layer LSTM + fc on last timestep.

    x_ref   : (S*Bp, I)   matmul dtype, time-major, batch-padded, flattened
    wih0_ref: (I, 4H)     matmul dtype
    whh0_ref: (H, 4H)     matmul dtype
    w1_ref  : (2H, 4H)    matmul dtype = concat([W_ih1^T, W_hh1^T], axis=0)
    b0_ref  : (1, 4H)     f32 (b_ih0 + b_hh0)
    b1_ref  : (1, 4H)     f32 (b_ih1 + b_hh1)
    fcw_ref : (H, 128)    matmul dtype, fc weight zero-padded to 128 out lanes
    fcb_ref : (1, 128)    f32
    out_ref : (Bp, 128)   f32 (column 0 holds the real fc output)
    xw0_ref : (S*Bp, 4H)  f32 VMEM scratch for the hoisted x-projection
    """
    Bp = batch
    H = whh0_ref.shape[0]
    H4 = 4 * H

    # Hoist weight loads out of the recurrence.
    whh0 = whh0_ref[...]
    w1 = w1_ref[...]
    mm_dtype = whh0.dtype

    # ---- layer-0 input projection for ALL timesteps: one big MXU matmul
    # (no sequential dependence on the x-path); bias b0 folded in here.
    xw0_ref[...] = (jnp.dot(x_ref[...], wih0_ref[...],
                            preferred_element_type=jnp.float32)
                    + b0_ref[...])

    # Hoist the layer-1 bias broadcast out of the loop.
    b1b = jnp.broadcast_to(b1_ref[...], (Bp, H4))

    def half_cell(g, c):
        # Two full-(Bp,4H)-vreg transcendentals instead of five sliced ones,
        # then cheap static lane slices for the gate combines (f32 throughout).
        sg = jax.nn.sigmoid(g)
        tg = jnp.tanh(g)
        i = sg[:, 0 * H:1 * H]          # PyTorch gate order [i, f, g, o]
        f = sg[:, 1 * H:2 * H]
        gg = tg[:, 2 * H:3 * H]
        o = sg[:, 3 * H:4 * H]
        c_new = f * c + i * gg
        h_new = o * jnp.tanh(c_new)
        return h_new, c_new

    def step(t, carry):
        h0, c0, h1, c1 = carry
        # layer 0: x-path precomputed; only the recurrent matmul on the chain.
        base = pl.multiple_of(t * Bp, Bp)
        g0 = (xw0_ref[pl.ds(base, Bp), :]
              + jnp.dot(h0.astype(mm_dtype), whh0,
                        preferred_element_type=jnp.float32))
        h0, c0 = half_cell(g0, c0)
        # layer 1: single fused matmul [h0_t, h1] @ concat([W_ih1, W_hh1]).
        in1 = jnp.concatenate([h0, h1], axis=1).astype(mm_dtype)   # (Bp, 2H)
        g1 = jnp.dot(in1, w1, preferred_element_type=jnp.float32) + b1b
        h1, c1 = half_cell(g1, c1)
        return (h0, c0, h1, c1)

    z = jnp.zeros((Bp, H), jnp.float32)
    _, _, h1, _ = lax.fori_loop(0, seq_len, step, (z, z, z, z), unroll=True)

    # fc on the last timestep's top-layer hidden state; output is a full
    # 128-lane-wide slab so the store is lane-dense (unmasked vst).
    out_ref[...] = (jnp.dot(h1.astype(mm_dtype), fcw_ref[...],
                            preferred_element_type=jnp.float32)
                    + fcb_ref[...])


@functools.partial(jax.jit, static_argnames=("matmul_dtype",))
def time_series_lstm_forward(x, params, *, matmul_dtype=jnp.float32):
    """x: (B, S, I) batch_first, like the PyTorch module. Returns (B, 1).

    matmul_dtype: jnp.float32 everywhere, or jnp.bfloat16 to feed the MXU
    bf16 operands (v6e/v7x native) while keeping f32 accumulation and f32
    elementwise cell math (safe on v5e, which has no bf16 VPU/EUP).
    """
    B, S, I = x.shape
    H = params["whh0_t"].shape[0]
    Bp = ((B + _SUBLANES_F32 - 1) // _SUBLANES_F32) * _SUBLANES_F32

    # time-major, batch-padded, flattened to (S*Bp, I) so the kernel's hoisted
    # layer-0 projection is one big matmul and the per-step read is an aligned
    # pl.ds slice of a VMEM scratch.
    x_tm = jnp.transpose(x.astype(jnp.float32), (1, 0, 2))       # (S, B, I)
    x_tm = jnp.pad(x_tm, ((0, 0), (0, Bp - B), (0, 0)))          # (S, Bp, I)
    x2d = x_tm.reshape(S * Bp, I).astype(matmul_dtype)

    wih0 = params["wih0_t"].astype(matmul_dtype)                 # (I, 4H)
    whh0 = params["whh0_t"].astype(matmul_dtype)                 # (H, 4H)
    w1 = jnp.concatenate([params["wih1_t"], params["whh1_t"]],
                         axis=0).astype(matmul_dtype)            # (2H, 4H)
    b0 = params["b0"].astype(jnp.float32)                        # (1, 4H)
    b1 = params["b1"].astype(jnp.float32)                        # (1, 4H)
    fcw = jnp.pad(params["fcw_t"],
                  ((0, 0), (0, _OUT_PAD - 1))).astype(matmul_dtype)   # (H, 128)
    fcb = jnp.pad(params["fcb"],
                  ((0, 0), (0, _OUT_PAD - 1))).astype(jnp.float32)    # (1, 128)

    args = (x2d, wih0, whh0, w1, b0, b1, fcw, fcb)
    vmem = pltpu.MemorySpace.VMEM
    in_specs = [pl.BlockSpec(memory_space=vmem) for _ in args]

    kernel = functools.partial(_lstm_kernel, seq_len=S, batch=Bp)
    out = pl.pallas_call(
        kernel,
        out_shape=jax.ShapeDtypeStruct((Bp, _OUT_PAD), jnp.float32),
        in_specs=in_specs,
        out_specs=pl.BlockSpec(memory_space=vmem),
        scratch_shapes=[pltpu.VMEM((S * Bp, 4 * H), jnp.float32)],
    )(*args)
    return out[:B, :1]


def init_params(key, input_size, hidden_size):
    """Deterministic synthetic init, matching nn.LSTM / nn.Linear shapes."""
    H = hidden_size
    ks = jax.random.split(key, 10)
    bound = 1.0 / jnp.sqrt(jnp.float32(H))

    def u(k, shape):
        return jax.random.uniform(k, shape, jnp.float32, -bound, bound)

    # PyTorch shapes: weight_ih_l0 (4H, I), weight_hh_l0 (4H, H), biases (4H,)
    w_ih0 = u(ks[0], (4 * H, input_size))
    w_hh0 = u(ks[1], (4 * H, H))
    b_ih0 = u(ks[2], (4 * H,))
    b_hh0 = u(ks[3], (4 * H,))
    w_ih1 = u(ks[4], (4 * H, H))     # layer-1 input is layer-0 hidden
    w_hh1 = u(ks[5], (4 * H, H))
    b_ih1 = u(ks[6], (4 * H,))
    b_hh1 = u(ks[7], (4 * H,))
    fc_w = u(ks[8], (1, H))          # nn.Linear(H, 1)
    fc_b = u(ks[9], (1,))

    return {
        "wih0_t": w_ih0.T,                       # (I, 4H)
        "whh0_t": w_hh0.T,                       # (H, 4H)
        "b0": (b_ih0 + b_hh0)[None, :],          # (1, 4H)
        "wih1_t": w_ih1.T,                       # (H, 4H)
        "whh1_t": w_hh1.T,                       # (H, 4H)
        "b1": (b_ih1 + b_hh1)[None, :],          # (1, 4H)
        "fcw_t": fc_w.T,                         # (H, 1)
        "fcb": fc_b[None, :],                    # (1, 1)
    }


def _reference_forward(x, params):
    """Pure-JAX f32 reference (same math as PyTorch inference forward)."""
    B, S, I = x.shape
    H = params["whh0_t"].shape[0]

    def cell(x_t, h, c, wih, whh, b):
        g = x_t @ wih + h @ whh + b
        i = jax.nn.sigmoid(g[:, 0 * H:1 * H])
        f = jax.nn.sigmoid(g[:, 1 * H:2 * H])
        gg = jnp.tanh(g[:, 2 * H:3 * H])
        o = jax.nn.sigmoid(g[:, 3 * H:4 * H])
        c = f * c + i * gg
        h = o * jnp.tanh(c)
        return h, c

    h0 = c0 = h1 = c1 = jnp.zeros((B, H), jnp.float32)
    for t in range(S):
        x_t = x[:, t, :].astype(jnp.float32)
        h0, c0 = cell(x_t, h0, c0, params["wih0_t"], params["whh0_t"], params["b0"])
        h1, c1 = cell(h0, h1, c1, params["wih1_t"], params["whh1_t"], params["b1"])
    return h1 @ params["fcw_t"] + params["fcb"]


if __name__ == "__main__":
    B, S, I, H = 2, 8, 4, 32   # small shapes consistent with the module

    key = jax.random.PRNGKey(0)
    k_x, k_p = jax.random.split(key)
    x = jax.random.normal(k_x, (B, S, I), jnp.float32)
    params = init_params(k_p, input_size=I, hidden_size=H)

    ref = _reference_forward(x, params)

    # f32 matmul-operand path: matches the pure-JAX reference tightly.
    out_f32 = jax.block_until_ready(time_series_lstm_forward(x, params))
    assert out_f32.shape == (B, 1)
    assert jnp.allclose(out_f32, ref, atol=2e-3, rtol=2e-3), (out_f32, ref)

    # bf16 MXU-operand path (v6e/v7x-native): f32 accumulation + f32 cell math.
    out_bf16 = jax.block_until_ready(
        time_series_lstm_forward(x, params, matmul_dtype=jnp.bfloat16))
    assert out_bf16.shape == (B, 1)
    assert jnp.allclose(out_bf16, ref, atol=1e-1, rtol=1e-1), (out_bf16, ref)

    print("KERNEL_OK")
</pallas_src>

<mosaic_0001>
module attributes {stable_mosaic.version = 11 : i64} {
  func.func @_lstm_kernel(%arg0: memref<64x4xf32, #tpu.memory_space<vmem>>, %arg1: memref<4x128xf32, #tpu.memory_space<vmem>>, %arg2: memref<32x128xf32, #tpu.memory_space<vmem>>, %arg3: memref<64x128xf32, #tpu.memory_space<vmem>>, %arg4: memref<1x128xf32, #tpu.memory_space<vmem>>, %arg5: memref<1x128xf32, #tpu.memory_space<vmem>>, %arg6: memref<32x128xf32, #tpu.memory_space<vmem>>, %arg7: memref<1x128xf32, #tpu.memory_space<vmem>>, %arg8: memref<8x128xf32, #tpu.memory_space<vmem>>, %arg9: memref<64x128xf32, #tpu.memory_space<vmem>>) attributes {dimension_semantics = [], scalar_prefetch = 0 : i64, scratch_operands = 1 : i64, tpu.core_type = #tpu.core_type<tc>} {
    %c0 = arith.constant 0 : index
    %c0_0 = arith.constant 0 : index
    %0 = vector.load %arg2[%c0, %c0_0] : memref<32x128xf32, #tpu.memory_space<vmem>>, vector<32x128xf32>
    %c0_1 = arith.constant 0 : index
    %c0_2 = arith.constant 0 : index
    %1 = vector.load %arg3[%c0_1, %c0_2] : memref<64x128xf32, #tpu.memory_space<vmem>>, vector<64x128xf32>
    %c0_3 = arith.constant 0 : index
    %c0_4 = arith.constant 0 : index
    %2 = vector.load %arg0[%c0_3, %c0_4] : memref<64x4xf32, #tpu.memory_space<vmem>>, vector<64x4xf32>
    %c0_5 = arith.constant 0 : index
    %c0_6 = arith.constant 0 : index
    %3 = vector.load %arg1[%c0_5, %c0_6] : memref<4x128xf32, #tpu.memory_space<vmem>>, vector<4x128xf32>
    %cst = arith.constant dense<0.000000e+00> : vector<64x128xf32>
    %4 = tpu.matmul %2, %3, %cst {dimension_numbers = #tpu.dot_dimension_numbers<[1], [0], [0], [1], [0, 0, 1, 1], [], []>} : vector<64x4xf32>, vector<4x128xf32>, vector<64x128xf32> -> vector<64x128xf32>
    %c0_7 = arith.constant 0 : index
    %c0_8 = arith.constant 0 : index
    %5 = vector.load %arg4[%c0_7, %c0_8] : memref<1x128xf32, #tpu.memory_space<vmem>>, vector<1x128xf32>
    %6 = vector.broadcast %5 : vector<1x128xf32> to vector<64x128xf32>
    %7 = arith.addf %4, %6 : vector<64x128xf32>
    %c0_9 = arith.constant 0 : index
    %c0_10 = arith.constant 0 : index
    %8 = vector.load %arg9[%c0_9, %c0_10] : memref<64x128xf32, #tpu.memory_space<vmem>>, vector<64x128xf32>
    tpu.vector_store %arg9[%c0_9, %c0_10], %7 {strides = array<i32>} : memref<64x128xf32, #tpu.memory_space<vmem>>, vector<64x128xf32>,
    %c0_11 = arith.constant 0 : index
    %c0_12 = arith.constant 0 : index
    %9 = vector.load %arg5[%c0_11, %c0_12] : memref<1x128xf32, #tpu.memory_space<vmem>>, vector<1x128xf32>
    %10 = vector.shape_cast %9 : vector<1x128xf32> to vector<1x128xf32>
    %11 = vector.broadcast %10 : vector<1x128xf32> to vector<8x128xf32>
    %cst_13 = arith.constant 0.000000e+00 : f32
    %12 = vector.broadcast %cst_13 : f32 to vector<8x32xf32>
    %c0_i32 = arith.constant 0 : i32
    %c8_i32 = arith.constant 8 : i32
    %13 = arith.muli %c0_i32, %c8_i32 : i32
    %14 = tpu.assume_multiple %13, 8 : i32
    %15 = arith.index_cast %14 : i32 to index
    %c0_14 = arith.constant 0 : index
    %16 = vector.load %arg9[%15, %c0_14] : memref<64x128xf32, #tpu.memory_space<vmem>>, vector<8x128xf32>
    %cst_15 = arith.constant dense<0.000000e+00> : vector<8x128xf32>
    %17 = tpu.matmul %12, %0, %cst_15 {dimension_numbers = #tpu.dot_dimension_numbers<[1], [0], [0], [1], [0, 0, 1, 1], [], []>} : vector<8x32xf32>, vector<32x128xf32>, vector<8x128xf32> -> vector<8x128xf32>
    %18 = arith.addf %16, %17 : vector<8x128xf32>
    %19 = arith.negf %18 : vector<8x128xf32>
    %20 = math.exp %19 : vector<8x128xf32>
    %cst_16 = arith.constant 1.000000e+00 : f32
    %21 = vector.broadcast %cst_16 : f32 to vector<8x128xf32>
    %22 = arith.addf %21, %20 : vector<8x128xf32>
    %23 = arith.divf %21, %22 : vector<8x128xf32>
    %24 = math.tanh %18 : vector<8x128xf32>
    %25 = vector.extract_strided_slice %23 {offsets = [0, 0], sizes = [8, 32], strides = [1, 1]} : vector<8x128xf32> to vector<8x32xf32>
    %26 = vector.extract_strided_slice %23 {offsets = [0, 32], sizes = [8, 32], strides = [1, 1]} : vector<8x128xf32> to vector<8x32xf32>
    %27 = vector.extract_strided_slice %24 {offsets = [0, 64], sizes = [8, 32], strides = [1, 1]} : vector<8x128xf32> to vector<8x32xf32>
    %28 = vector.extract_strided_slice %23 {offsets = [0, 96], sizes = [8, 32], strides = [1, 1]} : vector<8x128xf32> to vector<8x32xf32>
    %29 = arith.mulf %26, %12 : vector<8x32xf32>
    %30 = arith.mulf %25, %27 : vector<8x32xf32>
    %31 = arith.addf %29, %30 : vector<8x32xf32>
    %32 = math.tanh %31 : vector<8x32xf32>
    %33 = arith.mulf %28, %32 : vector<8x32xf32>
    %34 = tpu.concatenate %33, %12 in 1 : vector<8x32xf32>, vector<8x32xf32> -> vector<8x64xf32>
    %cst_17 = arith.constant dense<0.000000e+00> : vector<8x128xf32>
    %35 = tpu.matmul %34, %1, %cst_17 {dimension_numbers = #tpu.dot_dimension_numbers<[1], [0], [0], [1], [0, 0, 1, 1], [], []>} : vector<8x64xf32>, vector<64x128xf32>, vector<8x128xf32> -> vector<8x128xf32>
    %36 = arith.addf %35, %11 : vector<8x128xf32>
    %37 = arith.negf %36 : vector<8x128xf32>
    %38 = math.exp %37 : vector<8x128xf32>
    %cst_18 = arith.constant 1.000000e+00 : f32
    %39 = vector.broadcast %cst_18 : f32 to vector<8x128xf32>
    %40 = arith.addf %39, %38 : vector<8x128xf32>
    %41 = arith.divf %39, %40 : vector<8x128xf32>
    %42 = math.tanh %36 : vector<8x128xf32>
    %43 = vector.extract_strided_slice %41 {offsets = [0, 0], sizes = [8, 32], strides = [1, 1]} : vector<8x128xf32> to vector<8x32xf32>
    %44 = vector.extract_strided_slice %41 {offsets = [0, 32], sizes = [8, 32], strides = [1, 1]} : vector<8x128xf32> to vector<8x32xf32>
    %45 = vector.extract_strided_slice %42 {offsets = [0, 64], sizes = [8, 32], strides = [1, 1]} : vector<8x128xf32> to vector<8x32xf32>
    %46 = vector.extract_strided_slice %41 {offsets = [0, 96], sizes = [8, 32], strides = [1, 1]} : vector<8x128xf32> to vector<8x32xf32>
    %47 = arith.mulf %44, %12 : vector<8x32xf32>
    %48 = arith.mulf %43, %45 : vector<8x32xf32>
    %49 = arith.addf %47, %48 : vector<8x32xf32>
    %50 = math.tanh %49 : vector<8x32xf32>
    %51 = arith.mulf %46, %50 : vector<8x32xf32>
    %c1_i32 = arith.constant 1 : i32
    %c8_i32_19 = arith.constant 8 : i32
    %52 = arith.muli %c1_i32, %c8_i32_19 : i32
    %53 = tpu.assume_multiple %52, 8 : i32
    %54 = arith.index_cast %53 : i32 to index
    %c0_20 = arith.constant 0 : index
    %55 = vector.load %arg9[%54, %c0_20] : memref<64x128xf32, #tpu.memory_space<vmem>>, vector<8x128xf32>
    %cst_21 = arith.constant dense<0.000000e+00> : vector<8x128xf32>
    %56 = tpu.matmul %33, %0, %cst_21 {dimension_numbers = #tpu.dot_dimension_numbers<[1], [0], [0], [1], [0, 0, 1, 1], [], []>} : vector<8x32xf32>, vector<32x128xf32>, vector<8x128xf32> -> vector<8x128xf32>
    %57 = arith.addf %55, %56 : vector<8x128xf32>
    %58 = arith.negf %57 : vector<8x128xf32>
    %59 = math.exp %58 : vector<8x128xf32>
    %cst_22 = arith.constant 1.000000e+00 : f32
    %60 = vector.broadcast %cst_22 : f32 to vector<8x128xf32>
    %61 = arith.addf %60, %59 : vector<8x128xf32>
    %62 = arith.divf %60, %61 : vector<8x128xf32>
    %63 = math.tanh %57 : vector<8x128xf32>
    %64 = vector.extract_strided_slice %62 {offsets = [0, 0], sizes = [8, 32], strides = [1, 1]} : vector<8x128xf32> to vector<8x32xf32>
    %65 = vector.extract_strided_slice %62 {offsets = [0, 32], sizes = [8, 32], strides = [1, 1]} : vector<8x128xf32> to vector<8x32xf32>
    %66 = vector.extract_strided_slice %63 {offsets = [0, 64], sizes = [8, 32], strides = [1, 1]} : vector<8x128xf32> to vector<8x32xf32>
    %67 = vector.extract_strided_slice %62 {offsets = [0, 96], sizes = [8, 32], strides = [1, 1]} : vector<8x128xf32> to vector<8x32xf32>
    %68 = arith.mulf %65, %31 : vector<8x32xf32>
    %69 = arith.mulf %64, %66 : vector<8x32xf32>
    %70 = arith.addf %68, %69 : vector<8x32xf32>
    %71 = math.tanh %70 : vector<8x32xf32>
    %72 = arith.mulf %67, %71 : vector<8x32xf32>
    %73 = tpu.concatenate %72, %51 in 1 : vector<8x32xf32>, vector<8x32xf32> -> vector<8x64xf32>
    %cst_23 = arith.constant dense<0.000000e+00> : vector<8x128xf32>
    %74 = tpu.matmul %73, %1, %cst_23 {dimension_numbers = #tpu.dot_dimension_numbers<[1], [0], [0], [1], [0, 0, 1, 1], [], []>} : vector<8x64xf32>, vector<64x128xf32>, vector<8x128xf32> -> vector<8x128xf32>
    %75 = arith.addf %74, %11 : vector<8x128xf32>
    %76 = arith.negf %75 : vector<8x128xf32>
    %77 = math.exp %76 : vector<8x128xf32>
    %cst_24 = arith.constant 1.000000e+00 : f32
    %78 = vector.broadcast %cst_24 : f32 to vector<8x128xf32>
    %79 = arith.addf %78, %77 : vector<8x128xf32>
    %80 = arith.divf %78, %79 : vector<8x128xf32>
    %81 = math.tanh %75 : vector<8x128xf32>
    %82 = vector.extract_strided_slice %80 {offsets = [0, 0], sizes = [8, 32], strides = [1, 1]} : vector<8x128xf32> to vector<8x32xf32>
    %83 = vector.extract_strided_slice %80 {offsets = [0, 32], sizes = [8, 32], strides = [1, 1]} : vector<8x128xf32> to vector<8x32xf32>
    %84 = vector.extract_strided_slice %81 {offsets = [0, 64], sizes = [8, 32], strides = [1, 1]} : vector<8x128xf32> to vector<8x32xf32>
    %85 = vector.extract_strided_slice %80 {offsets = [0, 96], sizes = [8, 32], strides = [1, 1]} : vector<8x128xf32> to vector<8x32xf32>
    %86 = arith.mulf %83, %49 : vector<8x32xf32>
    %87 = arith.mulf %82, %84 : vector<8x32xf32>
    %88 = arith.addf %86, %87 : vector<8x32xf32>
    %89 = math.tanh %88 : vector<8x32xf32>
    %90 = arith.mulf %85, %89 : vector<8x32xf32>
    %c2_i32 = arith.constant 2 : i32
    %c8_i32_25 = arith.constant 8 : i32
    %91 = arith.muli %c2_i32, %c8_i32_25 : i32
    %92 = tpu.assume_multiple %91, 8 : i32
    %93 = arith.index_cast %92 : i32 to index
    %c0_26 = arith.constant 0 : index
    %94 = vector.load %arg9[%93, %c0_26] : memref<64x128xf32, #tpu.memory_space<vmem>>, vector<8x128xf32>
    %cst_27 = arith.constant dense<0.000000e+00> : vector<8x128xf32>
    %95 = tpu.matmul %72, %0, %cst_27 {dimension_numbers = #tpu.dot_dimension_numbers<[1], [0], [0], [1], [0, 0, 1, 1], [], []>} : vector<8x32xf32>, vector<32x128xf32>, vector<8x128xf32> -> vector<8x128xf32>
    %96 = arith.addf %94, %95 : vector<8x128xf32>
    %97 = arith.negf %96 : vector<8x128xf32>
    %98 = math.exp %97 : vector<8x128xf32>
    %cst_28 = arith.constant 1.000000e+00 : f32
    %99 = vector.broadcast %cst_28 : f32 to vector<8x128xf32>
    %100 = arith.addf %99, %98 : vector<8x128xf32>
    %101 = arith.divf %99, %100 : vector<8x128xf32>
    %102 = math.tanh %96 : vector<8x128xf32>
    %103 = vector.extract_strided_slice %101 {offsets = [0, 0], sizes = [8, 32], strides = [1, 1]} : vector<8x128xf32> to vector<8x32xf32>
    %104 = vector.extract_strided_slice %101 {offsets = [0, 32], sizes = [8, 32], strides = [1, 1]} : vector<8x128xf32> to vector<8x32xf32>
    %105 = vector.extract_strided_slice %102 {offsets = [0, 64], sizes = [8, 32], strides = [1, 1]} : vector<8x128xf32> to vector<8x32xf32>
    %106 = vector.extract_strided_slice %101 {offsets = [0, 96], sizes = [8, 32], strides = [1, 1]} : vector<8x128xf32> to vector<8x32xf32>
    %107 = arith.mulf %104, %70 : vector<8x32xf32>
    %108 = arith.mulf %103, %105 : vector<8x32xf32>
    %109 = arith.addf %107, %108 : vector<8x32xf32>
    %110 = math.tanh %109 : vector<8x32xf32>
    %111 = arith.mulf %106, %110 : vector<8x32xf32>
    %112 = tpu.concatenate %111, %90 in 1 : vector<8x32xf32>, vector<8x32xf32> -> vector<8x64xf32>
    %cst_29 = arith.constant dense<0.000000e+00> : vector<8x128xf32>
    %113 = tpu.matmul %112, %1, %cst_29 {dimension_numbers = #tpu.dot_dimension_numbers<[1], [0], [0], [1], [0, 0, 1, 1], [], []>} : vector<8x64xf32>, vector<64x128xf32>, vector<8x128xf32> -> vector<8x128xf32>
    %114 = arith.addf %113, %11 : vector<8x128xf32>
    %115 = arith.negf %114 : vector<8x128xf32>
    %116 = math.exp %115 : vector<8x128xf32>
    %cst_30 = arith.constant 1.000000e+00 : f32
    %117 = vector.broadcast %cst_30 : f32 to vector<8x128xf32>
    %118 = arith.addf %117, %116 : vector<8x128xf32>
    %119 = arith.divf %117, %118 : vector<8x128xf32>
    %120 = math.tanh %114 : vector<8x128xf32>
    %121 = vector.extract_strided_slice %119 {offsets = [0, 0], sizes = [8, 32], strides = [1, 1]} : vector<8x128xf32> to vector<8x32xf32>
    %122 = vector.extract_strided_slice %119 {offsets = [0, 32], sizes = [8, 32], strides = [1, 1]} : vector<8x128xf32> to vector<8x32xf32>
    %123 = vector.extract_strided_slice %120 {offsets = [0, 64], sizes = [8, 32], strides = [1, 1]} : vector<8x128xf32> to vector<8x32xf32>
    %124 = vector.extract_strided_slice %119 {offsets = [0, 96], sizes = [8, 32], strides = [1, 1]} : vector<8x128xf32> to vector<8x32xf32>
    %125 = arith.mulf %122, %88 : vector<8x32xf32>
    %126 = arith.mulf %121, %123 : vector<8x32xf32>
    %127 = arith.addf %125, %126 : vector<8x32xf32>
    %128 = math.tanh %127 : vector<8x32xf32>
    %129 = arith.mulf %124, %128 : vector<8x32xf32>
    %c3_i32 = arith.constant 3 : i32
    %c8_i32_31 = arith.constant 8 : i32
    %130 = arith.muli %c3_i32, %c8_i32_31 : i32
    %131 = tpu.assume_multiple %130, 8 : i32
    %132 = arith.index_cast %131 : i32 to index
    %c0_32 = arith.constant 0 : index
    %133 = vector.load %arg9[%132, %c0_32] : memref<64x128xf32, #tpu.memory_space<vmem>>, vector<8x128xf32>
    %cst_33 = arith.constant dense<0.000000e+00> : vector<8x128xf32>
    %134 = tpu.matmul %111, %0, %cst_33 {dimension_numbers = #tpu.dot_dimension_numbers<[1], [0], [0], [1], [0, 0, 1, 1], [], []>} : vector<8x32xf32>, vector<32x128xf32>, vector<8x128xf32> -> vector<8x128xf32>
    %135 = arith.addf %133, %134 : vector<8x128xf32>
    %136 = arith.negf %135 : vector<8x128xf32>
    %137 = math.exp %136 : vector<8x128xf32>
    %cst_34 = arith.constant 1.000000e+00 : f32
    %138 = vector.broadcast %cst_34 : f32 to vector<8x128xf32>
    %139 = arith.addf %138, %137 : vector<8x128xf32>
    %140 = arith.divf %138, %139 : vector<8x128xf32>
    %141 = math.tanh %135 : vector<8x128xf32>
    %142 = vector.extract_strided_slice %140 {offsets = [0, 0], sizes = [8, 32], strides = [1, 1]} : vector<8x128xf32> to vector<8x32xf32>
    %143 = vector.extract_strided_slice %140 {offsets = [0, 32], sizes = [8, 32], strides = [1, 1]} : vector<8x128xf32> to vector<8x32xf32>
    %144 = vector.extract_strided_slice %141 {offsets = [0, 64], sizes = [8, 32], strides = [1, 1]} : vector<8x128xf32> to vector<8x32xf32>
    %145 = vector.extract_strided_slice %140 {offsets = [0, 96], sizes = [8, 32], strides = [1, 1]} : vector<8x128xf32> to vector<8x32xf32>
    %146 = arith.mulf %143, %109 : vector<8x32xf32>
    %147 = arith.mulf %142, %144 : vector<8x32xf32>
    %148 = arith.addf %146, %147 : vector<8x32xf32>
    %149 = math.tanh %148 : vector<8x32xf32>
    %150 = arith.mulf %145, %149 : vector<8x32xf32>
    %151 = tpu.concatenate %150, %129 in 1 : vector<8x32xf32>, vector<8x32xf32> -> vector<8x64xf32>
    %cst_35 = arith.constant dense<0.000000e+00> : vector<8x128xf32>
    %152 = tpu.matmul %151, %1, %cst_35 {dimension_numbers = #tpu.dot_dimension_numbers<[1], [0], [0], [1], [0, 0, 1, 1], [], []>} : vector<8x64xf32>, vector<64x128xf32>, vector<8x128xf32> -> vector<8x128xf32>
    %153 = arith.addf %152, %11 : vector<8x128xf32>
    %154 = arith.negf %153 : vector<8x128xf32>
    %155 = math.exp %154 : vector<8x128xf32>
    %cst_36 = arith.constant 1.000000e+00 : f32
    %156 = vector.broadcast %cst_36 : f32 to vector<8x128xf32>
    %157 = arith.addf %156, %155 : vector<8x128xf32>
    %158 = arith.divf %156, %157 : vector<8x128xf32>
    %159 = math.tanh %153 : vector<8x128xf32>
    %160 = vector.extract_strided_slice %158 {offsets = [0, 0], sizes = [8, 32], strides = [1, 1]} : vector<8x128xf32> to vector<8x32xf32>
    %161 = vector.extract_strided_slice %158 {offsets = [0, 32], sizes = [8, 32], strides = [1, 1]} : vector<8x128xf32> to vector<8x32xf32>
    %162 = vector.extract_strided_slice %159 {offsets = [0, 64], sizes = [8, 32], strides = [1, 1]} : vector<8x128xf32> to vector<8x32xf32>
    %163 = vector.extract_strided_slice %158 {offsets = [0, 96], sizes = [8, 32], strides = [1, 1]} : vector<8x128xf32> to vector<8x32xf32>
    %164 = arith.mulf %161, %127 : vector<8x32xf32>
    %165 = arith.mulf %160, %162 : vector<8x32xf32>
    %166 = arith.addf %164, %165 : vector<8x32xf32>
    %167 = math.tanh %166 : vector<8x32xf32>
    %168 = arith.mulf %163, %167 : vector<8x32xf32>
    %c4_i32 = arith.constant 4 : i32
    %c8_i32_37 = arith.constant 8 : i32
    %169 = arith.muli %c4_i32, %c8_i32_37 : i32
    %170 = tpu.assume_multiple %169, 8 : i32
    %171 = arith.index_cast %170 : i32 to index
    %c0_38 = arith.constant 0 : index
    %172 = vector.load %arg9[%171, %c0_38] : memref<64x128xf32, #tpu.memory_space<vmem>>, vector<8x128xf32>
    %cst_39 = arith.constant dense<0.000000e+00> : vector<8x128xf32>
    %173 = tpu.matmul %150, %0, %cst_39 {dimension_numbers = #tpu.dot_dimension_numbers<[1], [0], [0], [1], [0, 0, 1, 1], [], []>} : vector<8x32xf32>, vector<32x128xf32>, vector<8x128xf32> -> vector<8x128xf32>
    %174 = arith.addf %172, %173 : vector<8x128xf32>
    %175 = arith.negf %174 : vector<8x128xf32>
    %176 = math.exp %175 : vector<8x128xf32>
    %cst_40 = arith.constant 1.000000e+00 : f32
    %177 = vector.broadcast %cst_40 : f32 to vector<8x128xf32>
    %178 = arith.addf %177, %176 : vector<8x128xf32>
    %179 = arith.divf %177, %178 : vector<8x128xf32>
    %180 = math.tanh %174 : vector<8x128xf32>
    %181 = vector.extract_strided_slice %179 {offsets = [0, 0], sizes = [8, 32], strides = [1, 1]} : vector<8x128xf32> to vector<8x32xf32>
    %182 = vector.extract_strided_slice %179 {offsets = [0, 32], sizes = [8, 32], strides = [1, 1]} : vector<8x128xf32> to vector<8x32xf32>
    %183 = vector.extract_strided_slice %180 {offsets = [0, 64], sizes = [8, 32], strides = [1, 1]} : vector<8x128xf32> to vector<8x32xf32>
    %184 = vector.extract_strided_slice %179 {offsets = [0, 96], sizes = [8, 32], strides = [1, 1]} : vector<8x128xf32> to vector<8x32xf32>
    %185 = arith.mulf %182, %148 : vector<8x32xf32>
    %186 = arith.mulf %181, %183 : vector<8x32xf32>
    %187 = arith.addf %185, %186 : vector<8x32xf32>
    %188 = math.tanh %187 : vector<8x32xf32>
    %189 = arith.mulf %184, %188 : vector<8x32xf32>
    %190 = tpu.concatenate %189, %168 in 1 : vector<8x32xf32>, vector<8x32xf32> -> vector<8x64xf32>
    %cst_41 = arith.constant dense<0.000000e+00> : vector<8x128xf32>
    %191 = tpu.matmul %190, %1, %cst_41 {dimension_numbers = #tpu.dot_dimension_numbers<[1], [0], [0], [1], [0, 0, 1, 1], [], []>} : vector<8x64xf32>, vector<64x128xf32>, vector<8x128xf32> -> vector<8x128xf32>
    %192 = arith.addf %191, %11 : vector<8x128xf32>
    %193 = arith.negf %192 : vector<8x128xf32>
    %194 = math.exp %193 : vector<8x128xf32>
    %cst_42 = arith.constant 1.000000e+00 : f32
    %195 = vector.broadcast %cst_42 : f32 to vector<8x128xf32>
    %196 = arith.addf %195, %194 : vector<8x128xf32>
    %197 = arith.divf %195, %196 : vector<8x128xf32>
    %198 = math.tanh %192 : vector<8x128xf32>
    %199 = vector.extract_strided_slice %197 {offsets = [0, 0], sizes = [8, 32], strides = [1, 1]} : vector<8x128xf32> to vector<8x32xf32>
    %200 = vector.extract_strided_slice %197 {offsets = [0, 32], sizes = [8, 32], strides = [1, 1]} : vector<8x128xf32> to vector<8x32xf32>
    %201 = vector.extract_strided_slice %198 {offsets = [0, 64], sizes = [8, 32], strides = [1, 1]} : vector<8x128xf32> to vector<8x32xf32>
    %202 = vector.extract_strided_slice %197 {offsets = [0, 96], sizes = [8, 32], strides = [1, 1]} : vector<8x128xf32> to vector<8x32xf32>
    %203 = arith.mulf %200, %166 : vector<8x32xf32>
    %204 = arith.mulf %199, %201 : vector<8x32xf32>
    %205 = arith.addf %203, %204 : vector<8x32xf32>
    %206 = math.tanh %205 : vector<8x32xf32>
    %207 = arith.mulf %202, %206 : vector<8x32xf32>
    %c5_i32 = arith.constant 5 : i32
    %c8_i32_43 = arith.constant 8 : i32
    %208 = arith.muli %c5_i32, %c8_i32_43 : i32
    %209 = tpu.assume_multiple %208, 8 : i32
    %210 = arith.index_cast %209 : i32 to index
    %c0_44 = arith.constant 0 : index
    %211 = vector.load %arg9[%210, %c0_44] : memref<64x128xf32, #tpu.memory_space<vmem>>, vector<8x128xf32>
    %cst_45 = arith.constant dense<0.000000e+00> : vector<8x128xf32>
    %212 = tpu.matmul %189, %0, %cst_45 {dimension_numbers = #tpu.dot_dimension_numbers<[1], [0], [0], [1], [0, 0, 1, 1], [], []>} : vector<8x32xf32>, vector<32x128xf32>, vector<8x128xf32> -> vector<8x128xf32>
    %213 = arith.addf %211, %212 : vector<8x128xf32>
    %214 = arith.negf %213 : vector<8x128xf32>
    %215 = math.exp %214 : vector<8x128xf32>
    %cst_46 = arith.constant 1.000000e+00 : f32
    %216 = vector.broadcast %cst_46 : f32 to vector<8x128xf32>
    %217 = arith.addf %216, %215 : vector<8x128xf32>
    %218 = arith.divf %216, %217 : vector<8x128xf32>
    %219 = math.tanh %213 : vector<8x128xf32>
    %220 = vector.extract_strided_slice %218 {offsets = [0, 0], sizes = [8, 32], strides = [1, 1]} : vector<8x128xf32> to vector<8x32xf32>
    %221 = vector.extract_strided_slice %218 {offsets = [0, 32], sizes = [8, 32], strides = [1, 1]} : vector<8x128xf32> to vector<8x32xf32>
    %222 = vector.extract_strided_slice %219 {offsets = [0, 64], sizes = [8, 32], strides = [1, 1]} : vector<8x128xf32> to vector<8x32xf32>
    %223 = vector.extract_strided_slice %218 {offsets = [0, 96], sizes = [8, 32], strides = [1, 1]} : vector<8x128xf32> to vector<8x32xf32>
    %224 = arith.mulf %221, %187 : vector<8x32xf32>
    %225 = arith.mulf %220, %222 : vector<8x32xf32>
    %226 = arith.addf %224, %225 : vector<8x32xf32>
    %227 = math.tanh %226 : vector<8x32xf32>
    %228 = arith.mulf %223, %227 : vector<8x32xf32>
    %229 = tpu.concatenate %228, %207 in 1 : vector<8x32xf32>, vector<8x32xf32> -> vector<8x64xf32>
    %cst_47 = arith.constant dense<0.000000e+00> : vector<8x128xf32>
    %230 = tpu.matmul %229, %1, %cst_47 {dimension_numbers = #tpu.dot_dimension_numbers<[1], [0], [0], [1], [0, 0, 1, 1], [], []>} : vector<8x64xf32>, vector<64x128xf32>, vector<8x128xf32> -> vector<8x128xf32>
    %231 = arith.addf %230, %11 : vector<8x128xf32>
    %232 = arith.negf %231 : vector<8x128xf32>
    %233 = math.exp %232 : vector<8x128xf32>
    %cst_48 = arith.constant 1.000000e+00 : f32
    %234 = vector.broadcast %cst_48 : f32 to vector<8x128xf32>
    %235 = arith.addf %234, %233 : vector<8x128xf32>
    %236 = arith.divf %234, %235 : vector<8x128xf32>
    %237 = math.tanh %231 : vector<8x128xf32>
    %238 = vector.extract_strided_slice %236 {offsets = [0, 0], sizes = [8, 32], strides = [1, 1]} : vector<8x128xf32> to vector<8x32xf32>
    %239 = vector.extract_strided_slice %236 {offsets = [0, 32], sizes = [8, 32], strides = [1, 1]} : vector<8x128xf32> to vector<8x32xf32>
    %240 = vector.extract_strided_slice %237 {offsets = [0, 64], sizes = [8, 32], strides = [1, 1]} : vector<8x128xf32> to vector<8x32xf32>
    %241 = vector.extract_strided_slice %236 {offsets = [0, 96], sizes = [8, 32], strides = [1, 1]} : vector<8x128xf32> to vector<8x32xf32>
    %242 = arith.mulf %239, %205 : vector<8x32xf32>
    %243 = arith.mulf %238, %240 : vector<8x32xf32>
    %244 = arith.addf %242, %243 : vector<8x32xf32>
    %245 = math.tanh %244 : vector<8x32xf32>
    %246 = arith.mulf %241, %245 : vector<8x32xf32>
    %c6_i32 = arith.constant 6 : i32
    %c8_i32_49 = arith.constant 8 : i32
    %247 = arith.muli %c6_i32, %c8_i32_49 : i32
    %248 = tpu.assume_multiple %247, 8 : i32
    %249 = arith.index_cast %248 : i32 to index
    %c0_50 = arith.constant 0 : index
    %250 = vector.load %arg9[%249, %c0_50] : memref<64x128xf32, #tpu.memory_space<vmem>>, vector<8x128xf32>
    %cst_51 = arith.constant dense<0.000000e+00> : vector<8x128xf32>
    %251 = tpu.matmul %228, %0, %cst_51 {dimension_numbers = #tpu.dot_dimension_numbers<[1], [0], [0], [1], [0, 0, 1, 1], [], []>} : vector<8x32xf32>, vector<32x128xf32>, vector<8x128xf32> -> vector<8x128xf32>
    %252 = arith.addf %250, %251 : vector<8x128xf32>
    %253 = arith.negf %252 : vector<8x128xf32>
    %254 = math.exp %253 : vector<8x128xf32>
    %cst_52 = arith.constant 1.000000e+00 : f32
    %255 = vector.broadcast %cst_52 : f32 to vector<8x128xf32>
    %256 = arith.addf %255, %254 : vector<8x128xf32>
    %257 = arith.divf %255, %256 : vector<8x128xf32>
    %258 = math.tanh %252 : vector<8x128xf32>
    %259 = vector.extract_strided_slice %257 {offsets = [0, 0], sizes = [8, 32], strides = [1, 1]} : vector<8x128xf32> to vector<8x32xf32>
    %260 = vector.extract_strided_slice %257 {offsets = [0, 32], sizes = [8, 32], strides = [1, 1]} : vector<8x128xf32> to vector<8x32xf32>
    %261 = vector.extract_strided_slice %258 {offsets = [0, 64], sizes = [8, 32], strides = [1, 1]} : vector<8x128xf32> to vector<8x32xf32>
    %262 = vector.extract_strided_slice %257 {offsets = [0, 96], sizes = [8, 32], strides = [1, 1]} : vector<8x128xf32> to vector<8x32xf32>
    %263 = arith.mulf %260, %226 : vector<8x32xf32>
    %264 = arith.mulf %259, %261 : vector<8x32xf32>
    %265 = arith.addf %263, %264 : vector<8x32xf32>
    %266 = math.tanh %265 : vector<8x32xf32>
    %267 = arith.mulf %262, %266 : vector<8x32xf32>
    %268 = tpu.concatenate %267, %246 in 1 : vector<8x32xf32>, vector<8x32xf32> -> vector<8x64xf32>
    %cst_53 = arith.constant dense<0.000000e+00> : vector<8x128xf32>
    %269 = tpu.matmul %268, %1, %cst_53 {dimension_numbers = #tpu.dot_dimension_numbers<[1], [0], [0], [1], [0, 0, 1, 1], [], []>} : vector<8x64xf32>, vector<64x128xf32>, vector<8x128xf32> -> vector<8x128xf32>
    %270 = arith.addf %269, %11 : vector<8x128xf32>
    %271 = arith.negf %270 : vector<8x128xf32>
    %272 = math.exp %271 : vector<8x128xf32>
    %cst_54 = arith.constant 1.000000e+00 : f32
    %273 = vector.broadcast %cst_54 : f32 to vector<8x128xf32>
    %274 = arith.addf %273, %272 : vector<8x128xf32>
    %275 = arith.divf %273, %274 : vector<8x128xf32>
    %276 = math.tanh %270 : vector<8x128xf32>
    %277 = vector.extract_strided_slice %275 {offsets = [0, 0], sizes = [8, 32], strides = [1, 1]} : vector<8x128xf32> to vector<8x32xf32>
    %278 = vector.extract_strided_slice %275 {offsets = [0, 32], sizes = [8, 32], strides = [1, 1]} : vector<8x128xf32> to vector<8x32xf32>
    %279 = vector.extract_strided_slice %276 {offsets = [0, 64], sizes = [8, 32], strides = [1, 1]} : vector<8x128xf32> to vector<8x32xf32>
    %280 = vector.extract_strided_slice %275 {offsets = [0, 96], sizes = [8, 32], strides = [1, 1]} : vector<8x128xf32> to vector<8x32xf32>
    %281 = arith.mulf %278, %244 : vector<8x32xf32>
    %282 = arith.mulf %277, %279 : vector<8x32xf32>
    %283 = arith.addf %281, %282 : vector<8x32xf32>
    %284 = math.tanh %283 : vector<8x32xf32>
    %285 = arith.mulf %280, %284 : vector<8x32xf32>
    %c7_i32 = arith.constant 7 : i32
    %c8_i32_55 = arith.constant 8 : i32
    %286 = arith.muli %c7_i32, %c8_i32_55 : i32
    %287 = tpu.assume_multiple %286, 8 : i32
    %288 = arith.index_cast %287 : i32 to index
    %c0_56 = arith.constant 0 : index
    %289 = vector.load %arg9[%288, %c0_56] : memref<64x128xf32, #tpu.memory_space<vmem>>, vector<8x128xf32>
    %cst_57 = arith.constant dense<0.000000e+00> : vector<8x128xf32>
    %290 = tpu.matmul %267, %0, %cst_57 {dimension_numbers = #tpu.dot_dimension_numbers<[1], [0], [0], [1], [0, 0, 1, 1], [], []>} : vector<8x32xf32>, vector<32x128xf32>, vector<8x128xf32> -> vector<8x128xf32>
    %291 = arith.addf %289, %290 : vector<8x128xf32>
    %292 = arith.negf %291 : vector<8x128xf32>
    %293 = math.exp %292 : vector<8x128xf32>
    %cst_58 = arith.constant 1.000000e+00 : f32
    %294 = vector.broadcast %cst_58 : f32 to vector<8x128xf32>
    %295 = arith.addf %294, %293 : vector<8x128xf32>
    %296 = arith.divf %294, %295 : vector<8x128xf32>
    %297 = math.tanh %291 : vector<8x128xf32>
    %298 = vector.extract_strided_slice %296 {offsets = [0, 0], sizes = [8, 32], strides = [1, 1]} : vector<8x128xf32> to vector<8x32xf32>
    %299 = vector.extract_strided_slice %296 {offsets = [0, 32], sizes = [8, 32], strides = [1, 1]} : vector<8x128xf32> to vector<8x32xf32>
    %300 = vector.extract_strided_slice %297 {offsets = [0, 64], sizes = [8, 32], strides = [1, 1]} : vector<8x128xf32> to vector<8x32xf32>
    %301 = vector.extract_strided_slice %296 {offsets = [0, 96], sizes = [8, 32], strides = [1, 1]} : vector<8x128xf32> to vector<8x32xf32>
    %302 = arith.mulf %299, %265 : vector<8x32xf32>
    %303 = arith.mulf %298, %300 : vector<8x32xf32>
    %304 = arith.addf %302, %303 : vector<8x32xf32>
    %305 = math.tanh %304 : vector<8x32xf32>
    %306 = arith.mulf %301, %305 : vector<8x32xf32>
    %307 = tpu.concatenate %306, %285 in 1 : vector<8x32xf32>, vector<8x32xf32> -> vector<8x64xf32>
    %cst_59 = arith.constant dense<0.000000e+00> : vector<8x128xf32>
    %308 = tpu.matmul %307, %1, %cst_59 {dimension_numbers = #tpu.dot_dimension_numbers<[1], [0], [0], [1], [0, 0, 1, 1], [], []>} : vector<8x64xf32>, vector<64x128xf32>, vector<8x128xf32> -> vector<8x128xf32>
    %309 = arith.addf %308, %11 : vector<8x128xf32>
    %310 = arith.negf %309 : vector<8x128xf32>
    %311 = math.exp %310 : vector<8x128xf32>
    %cst_60 = arith.constant 1.000000e+00 : f32
    %312 = vector.broadcast %cst_60 : f32 to vector<8x128xf32>
    %313 = arith.addf %312, %311 : vector<8x128xf32>
    %314 = arith.divf %312, %313 : vector<8x128xf32>
    %315 = math.tanh %309 : vector<8x128xf32>
    %316 = vector.extract_strided_slice %314 {offsets = [0, 0], sizes = [8, 32], strides = [1, 1]} : vector<8x128xf32> to vector<8x32xf32>
    %317 = vector.extract_strided_slice %314 {offsets = [0, 32], sizes = [8, 32], strides = [1, 1]} : vector<8x128xf32> to vector<8x32xf32>
    %318 = vector.extract_strided_slice %315 {offsets = [0, 64], sizes = [8, 32], strides = [1, 1]} : vector<8x128xf32> to vector<8x32xf32>
    %319 = vector.extract_strided_slice %314 {offsets = [0, 96], sizes = [8, 32], strides = [1, 1]} : vector<8x128xf32> to vector<8x32xf32>
    %320 = arith.mulf %317, %283 : vector<8x32xf32>
    %321 = arith.mulf %316, %318 : vector<8x32xf32>
    %322 = arith.addf %320, %321 : vector<8x32xf32>
    %323 = math.tanh %322 : vector<8x32xf32>
    %324 = arith.mulf %319, %323 : vector<8x32xf32>
    %c8_i32_61 = arith.constant 8 : i32
    %c0_62 = arith.constant 0 : index
    %c0_63 = arith.constant 0 : index
    %325 = vector.load %arg6[%c0_62, %c0_63] : memref<32x128xf32, #tpu.memory_space<vmem>>, vector<32x128xf32>
    %cst_64 = arith.constant dense<0.000000e+00> : vector<8x128xf32>
    %326 = tpu.matmul %324, %325, %cst_64 {dimension_numbers = #tpu.dot_dimension_numbers<[1], [0], [0], [1], [0, 0, 1, 1], [], []>} : vector<8x32xf32>, vector<32x128xf32>, vector<8x128xf32> -> vector<8x128xf32>
    %c0_65 = arith.constant 0 : index
    %c0_66 = arith.constant 0 : index
    %327 = vector.load %arg7[%c0_65, %c0_66] : memref<1x128xf32, #tpu.memory_space<vmem>>, vector<1x128xf32>
    %328 = vector.broadcast %327 : vector<1x128xf32> to vector<8x128xf32>
    %329 = arith.addf %326, %328 : vector<8x128xf32>
    %c0_67 = arith.constant 0 : index
    %c0_68 = arith.constant 0 : index
    %330 = vector.load %arg8[%c0_67, %c0_68] : memref<8x128xf32, #tpu.memory_space<vmem>>, vector<8x128xf32>
    tpu.vector_store %arg8[%c0_67, %c0_68], %329 {strides = array<i32>} : memref<8x128xf32, #tpu.memory_space<vmem>>, vector<8x128xf32>,
    return
  }
}

</mosaic_0001>

<bundles_post_ra>
// kernel: time_series_lstm_forward.1
= control target key start
LH: loop header
LB: loop body
LE: loop exit
PB: predicated region body
PF: predicated region fallthrough
CT: control target
= control target key end

     0   :  { %vm82_vm0 = vcmask 1043456   ;;  %vm57_vm1 = vcmask 31744   ;;  %v2516_v0 = vmov 0.0   ;;  %vm2517_vm2 = vmmov 0   ;;  %s2518_s20 = smov 64   ;;  %s2519_s21 = smov 32   ;;  %s3124_s1 = inlined_call_operand.vmem [shape: f32[4,128], index: 1, kind: input, shape index: {}]   ;;  %s3125_s2 = inlined_call_operand.vmem [shape: f32[32,128], index: 2, kind: input, shape index: {}]   ;;  %s3126_s0 = inlined_call_operand.vmem [shape: f32[64,4], index: 0, kind: input, shape index: {}]   ;;  %s3127_s4 = inlined_call_operand.vmem [shape: f32[1,128], index: 4, kind: input, shape index: {}]   ;;  %s3128_s3 = inlined_call_operand.vmem [shape: f32[64,128], index: 3, kind: input, shape index: {}]   ;;  %s3129_s5 = inlined_call_operand.vmem [shape: f32[1,128], index: 5, kind: input, shape index: {}]   ;;  %s3130_s6 = inlined_call_operand.vmem [shape: f32[32,128], index: 6, kind: input, shape index: {}]   ;;  %s3131_s7 = inlined_call_operand.vmem [shape: f32[1,128], index: 7, kind: input, shape index: {}]   ;;  %s3132_s8 = inlined_call_operand.vmem [shape: f32[8,128], index: 8, kind: output, shape index: {}]  }
   0x1   :  { %2119 = vmatprep.subr.mxu1 %v2516_v0  ;;  %v49_v1 = vld [vmem:[%s3124_s1] sm:$0xf]  ;;  %v2572_v2 = vld [vmem:[%s3125_s2 + $0x18] sm:$0xff]  ;;  %2127 = vmatprep.mubr.msk.f32.mxu1 %vm2517_vm2, %v2516_v0  ;;  %v42_v4 = vld [vmem:[%s3126_s0 + $0x8] sm:$0xff]  ;;  %vm207_vm3 = vcmask 261120   ;;  %vm311_vm4 = vcmask 523264  }
   0x2   :  { %v41_v3 = vld [vmem:[%s3126_s0] sm:$0xff]  ;;  %2105 = vmatprep.subr.msk.mxu0 %vm82_vm0, %v49_v1  ;;  %2120 = vmatpush3.msra.mxu1 %v2572_v2  ;;  %v2586_v5 = vld [vmem:[%s3125_s2 + $0x10] sm:$0xff]  ;;  %v2594_v6 = vld [vmem:[%s3125_s2 + $0x8] sm:$0xff] }
   0x3   :  { %2106 = vmatpush3.msk.msra.mxu0 %vm82_vm0, %v49_v1  ;;  %2107 = vmatprep.mubr.msk.f32.mxu0 %vm57_vm1, %v41_v3  ;;  %v2602_v7 = vld [vmem:[%s3125_s2] sm:$0xff]  ;;  %v43_v25 = vld [vmem:[%s3126_s0 + $0x10] sm:$0xff]  ;;  %v44_v26 = vld [vmem:[%s3126_s0 + $0x18] sm:$0xff] }
   0x4   :  { %2121 = vmatprep.subr.mxu1 %v2516_v0  ;;  %2108 = vmatmul.mubr.msk.f32.vlgmr.msra.gmra.mxu0 %vm57_vm1, %v42_v4  ;;  %v2624_v9 = vld [vmem:[%s3127_s4] ss:$0 sm:$0xff]  ;;  %v2641_v27 = vld [vmem:[%s3128_s3 + $0x38] sm:$0xff]  ;;  %v2647_v28 = vld [vmem:[%s3128_s3 + $0x30] sm:$0xff] }
   0x5   :  { %2122 = vmatpush3.msra.mxu1 %v2586_v5  ;;  %2130 = vmatprep.subr.mxu0 %v2516_v0  ;;  %v45_v29 = vld [vmem:[%s3126_s0 + $0x20] sm:$0xff]  ;;  %v2658_v30 = vld [vmem:[%s3128_s3 + $0x28] sm:$0xff]  ;;  %v47_v33 = vld [vmem:[%s3126_s0 + $0x30] sm:$0xff] }
   0x6   :  { %2123 = vmatprep.subr.mxu1 %v2516_v0  ;;  %2110 = vmatprep.mubr.msk.f32.mxu0 %vm57_vm1, %v43_v25  ;;  %v46_v31 = vld [vmem:[%s3126_s0 + $0x28] sm:$0xff]  ;;  %v2669_v32 = vld [vmem:[%s3128_s3 + $0x20] sm:$0xff]  ;;  %v2680_v34 = vld [vmem:[%s3128_s3 + $0x18] sm:$0xff] }
   0x7   :  { %2124 = vmatpush3.msra.mxu1 %v2594_v6  ;;  %2131 = vmatpush3.msra.mxu0 %v2641_v27  ;;  %v48_v35 = vld [vmem:[%s3126_s0 + $0x38] sm:$0xff]  ;;  %v2692_v37 = vld [vmem:[%s3128_s3 + $0x10] sm:$0xff]  ;;  %v2700_v38 = vld [vmem:[%s3128_s3 + $0x8] sm:$0xff] }
   0x8   :  { %2125 = vmatprep.subr.mxu1 %v2516_v0  ;;  %2132 = vmatprep.subr.mxu0 %v2516_v0  ;;  %v2709_v39 = vld [vmem:[%s3128_s3] sm:$0xff] }
   0x9   :  { %2126 = vmatpush3.msra.mxu1 %v2602_v7  ;;  %2111 = vmatmul.mubr.msk.f32.gmra.mxu0 %vm57_vm1, %v44_v26  ;;  %v2764_v51 = vld [vmem:[%s3129_s5] ss:$0 sm:$0xff] }
   0xa   :  { %2128 = vmatmul.mubr.f32.vlgmr.msra.gmra.mxu1 %v2516_v0  ;;  %2149 = vmatprep.subr.mxu1 %v2516_v0 }
   0xb   :  { %2150 = vmatpush3.msra.mxu1 %v2572_v2  ;;  %2157 = vmatprep.mubr.msk.f32.mxu1 %vm2517_vm2, %v2516_v0 }
   0xc   :  { %2151 = vmatprep.subr.mxu1 %v2516_v0  ;;  %2133 = vmatpush3.msra.mxu0 %v2647_v28 }
   0xd   :  { %2152 = vmatpush3.msra.mxu1 %v2586_v5  ;;  %2113 = vmatprep.mubr.msk.f32.mxu0 %vm57_vm1, %v45_v29 }
   0xe   :  { %2153 = vmatprep.subr.mxu1 %v2516_v0  ;;  %2134 = vmatprep.subr.mxu0 %v2516_v0 }
   0xf   :  { %2154 = vmatpush3.msra.mxu1 %v2594_v6  ;;  %2135 = vmatpush3.msra.mxu0 %v2658_v30 }
  0x10   :  { %2155 = vmatprep.subr.mxu1 %v2516_v0  ;;  %2136 = vmatprep.subr.mxu0 %v2516_v0 }
  0x11   :  { %2156 = vmatpush3.msra.mxu1 %v2602_v7  ;;  %2114 = vmatmul.mubr.msk.f32.gmra.mxu0 %vm57_vm1, %v46_v31 }
  0x12   :  { %2160 = vmatprep.subr.mxu1 %v2516_v0  ;;  %2137 = vmatpush3.msra.mxu0 %v2669_v32 }
  0x13   :  { %2116 = vmatprep.mubr.msk.f32.mxu0 %vm57_vm1, %v47_v33  ;;  %2138 = vmatprep.subr.mxu0 %v2516_v0 }
  0x14   :  { %2139 = vmatpush3.msra.mxu0 %v2680_v34 }
  0x15   :  { %2140 = vmatprep.subr.mxu0 %v2516_v0  ;;  %2117 = vmatmul.mubr.msk.f32.gmra.mxu0 %vm57_vm1, %v48_v35 }
  0x16   :  { %2141 = vmatpush3.msra.mxu0 %v2692_v37  ;;  %2146 = vmatprep.mubr.msk.f32.mxu0 %vm2517_vm2, %v2516_v0 }
  0x17   :  { %2142 = vmatprep.subr.mxu0 %v2516_v0 }
  0x18   :  { %2143 = vmatpush3.msra.mxu0 %v2700_v38 }
  0x19   :  { %2144 = vmatprep.subr.mxu0 %v2516_v0 }
  0x1a   :  { %2145 = vmatpush3.msra.mxu0 %v2709_v39 }
  0x1b   :  { %2179 = vmatprep.subr.mxu0 %v2516_v0 }
  0xc4   :  { %v2619_v8 = vpop.f32.mrf.mxu0 }
  0xc5   :  { %v158_v49 = vadd.f32 %v2619_v8, %v2624_v9 }
  0xc6   :  { %v152_v10 = vpop.f32.mrf.mxu0 }
  0xc7   :  { %v153_v11 = vadd.f32 %v2624_v9, %v152_v10 }
  0xc9   :  { %v2747_v44 = vpop.f32.mrf.mxu0 }
  0xca   :  { %v277_v12 = vpop.f32.mrf.mxu1 }
  0xcb   :  { %v281_v13 = vadd.f32 %v277_v12, %v153_v11  ;;  %v2749_v45 = vpop.f32.mrf.mxu0 }
  0xcc   :  { %v2129_v14 = vpop.f32.mrf.mxu1  ;;  %v163_v33 = vadd.f32 %v2624_v9, %v2749_v45 }
  0xcd   :  { %2374 = vtanh.f32 %v281_v13  ;;  %v1946_v16 = vmul.f32 -1.442695, %v281_v13 }
  0xcf   :  { %2376 = vpow2.f32 %v1946_v16 }
  0xd1   :  { %v2751_v46 = vpop.f32.mrf.mxu0 }
  0xd3   :  { %v2753_v47 = vpop.f32.mrf.mxu0 }
  0xd5   :  { %v2755_v48 = vpop.f32.mrf.mxu0 }
  0xd7   :  { %v2759_v50 = vpop.f32.mrf.mxu0 }
  0xda   :  { %v2375_v15 = vpop.eup %2374 }
  0xdb   :  { %291 = vrot.lane.b32.xlu0 %v2375_v15, %s2518_s20 }
  0xdc   :  { %v2377_v17 = vpop.eup %2376 }
  0xdd   :  { %v285_v18 = vadd.f32 1.0, %v2377_v17 }
  0xdf   :  { %2378 = vrcp.f32 %v285_v18 }
  0xec   :  { %v2379_v19 = vpop.eup %2378 }
  0xed   :  { %v289_v22 = vmul.f32 0.0, %v2379_v19 }
 0x14d   :  { %v292_v20 = vpop.permute.xlu0 %291 }
 0x14e   :  { %v294_v21 = vmul.f32 %v2379_v19, %v292_v20 }
 0x150   :  { %296 = vrot.lane.b32.xlu0 %v294_v21, %s2519_s21 }
 0x1c2   :  { %v297_v23 = vpop.permute.xlu0 %296 }
 0x1c3   :  { %v2629_v24 = vadd.f32 %v297_v23, %v289_v22 }
 0x1c5   :  { %2380 = vtanh.f32 %v2629_v24 }
 0x1d2   :  { %v2381_v36 = vpop.eup %2380 }
 0x1d3   :  { %302 = vrot.lane.b32.xlu1 %v2381_v36, %s2518_s20 }
 0x245   :  { %v303_v40 = vpop.permute.xlu1 %302 }
 0x246   :  { %v305_v41 = vmul.f32 %v2379_v19, %v303_v40 }
 0x248   :  { %307 = vrot.lane.b32.xlu1 %v305_v41, %s2519_s21 }
 0x2ba   :  { %v308_v42 = vpop.permute.xlu1 %307 }
 0x2bb   :  { %v310_v43 = vsel %vm207_vm3, %v308_v42, 0.0  ;;  %2158 = vmatmul.mubr.msk.f32.vlgmr.msra.gmra.mxu1 %vm207_vm3, %v308_v42 }
 0x2bc   :  { %2147 = vmatmul.mubr.msk.f32.vlgmr.msra.gmra.mxu0 %vm311_vm4, %v310_v43  ;;  %2161 = vmatpush3.msra.mxu1 %v2641_v27 }
 0x2bd   :  { %2162 = vmatprep.subr.mxu1 %v2516_v0  ;;  %2180 = vmatpush3.msra.mxu0 %v2572_v2 }
 0x2be   :  { %2163 = vmatpush3.msra.mxu1 %v2647_v28  ;;  %2181 = vmatprep.subr.mxu0 %v2516_v0 }
 0x2bf   :  { %2164 = vmatprep.subr.mxu1 %v2516_v0  ;;  %2182 = vmatpush3.msra.mxu0 %v2586_v5 }
 0x2c0   :  { %2165 = vmatpush3.msra.mxu1 %v2658_v30  ;;  %2183 = vmatprep.subr.mxu0 %v2516_v0 }
 0x2c1   :  { %2166 = vmatprep.subr.mxu1 %v2516_v0  ;;  %2184 = vmatpush3.msra.mxu0 %v2594_v6 }
 0x2c2   :  { %2167 = vmatpush3.msra.mxu1 %v2669_v32  ;;  %2185 = vmatprep.subr.mxu0 %v2516_v0 }
 0x2c3   :  { %2168 = vmatprep.subr.mxu1 %v2516_v0  ;;  %2186 = vmatpush3.msra.mxu0 %v2602_v7 }
 0x2c4   :  { %2169 = vmatpush3.msra.mxu1 %v2680_v34  ;;  %2187 = vmatprep.mubr.msk.f32.mxu0 %vm2517_vm2, %v2516_v0 }
 0x2c5   :  { %2170 = vmatprep.subr.mxu1 %v2516_v0  ;;  %2176 = vmatprep.mubr.msk.f32.mxu1 %vm2517_vm2, %v2516_v0 }
 0x2c6   :  { %2171 = vmatpush3.msra.mxu1 %v2692_v37  ;;  %2190 = vmatprep.subr.mxu0 %v2516_v0 }
 0x2c7   :  { %2172 = vmatprep.subr.mxu1 %v2516_v0 }
 0x2c8   :  { %2173 = vmatpush3.msra.mxu1 %v2700_v38 }
 0x2c9   :  { %2174 = vmatprep.subr.mxu1 %v2516_v0 }
 0x2ca   :  { %2175 = vmatpush3.msra.mxu1 %v2709_v39 }
 0x2cb   :  { %2209 = vmatprep.subr.mxu1 %v2516_v0 }
 0x37b   :  { %v479_v52 = vpop.f32.mrf.mxu1 }
 0x37c   :  { %v483_v53 = vadd.f32 %v479_v52, %v158_v49  ;;  %v381_v54 = vpop.f32.mrf.mxu0 }
 0x37d   :  { %v382_v55 = vadd.f32 %v2764_v51, %v381_v54  ;;  %v2159_v56 = vpop.f32.mrf.mxu1 }
 0x37e   :  { %2382 = vtanh.f32 %v483_v53  ;;  %v2148_v57 = vpop.f32.mrf.mxu0  ;;  %v1950_v60 = vmul.f32 -1.442695, %v483_v53 }
 0x37f   :  { %2384 = vtanh.f32 %v382_v55  ;;  %v1948_v61 = vmul.f32 -1.442695, %v382_v55 }
 0x380   :  { %2386 = vpow2.f32 %v1950_v60 }
 0x381   :  { %2388 = vpow2.f32 %v1948_v61 }
 0x38b   :  { %v2383_v58 = vpop.eup %2382 }
 0x38c   :  { %v2385_v59 = vpop.eup %2384  ;;  %493 = vrot.lane.b32.xlu1 %v2383_v58, %s2518_s20 }
 0x38d   :  { %394 = vrot.lane.b32.xlu0 %v2385_v59, %s2518_s20  ;;  %v2387_v62 = vpop.eup %2386 }
 0x38e   :  { %v2389_v63 = vpop.eup %2388  ;;  %v487_v1 = vadd.f32 1.0, %v2387_v62 }
 0x38f   :  { %v388_v3 = vadd.f32 1.0, %v2389_v63 }
 0x390   :  { %2390 = vrcp.f32 %v487_v1 }
 0x391   :  { %2392 = vrcp.f32 %v388_v3 }
 0x39d   :  { %v2391_v4 = vpop.eup %2390 }
 0x39e   :  { %v2393_v10 = vpop.eup %2392  ;;  %v491_v14 = vmul.f32 %v2391_v4, %v2629_v24 }
 0x39f   :  { %v392_v16 = vmul.f32 0.0, %v2393_v10 }
 0x3fe   :  { %v494_v8 = vpop.permute.xlu1 %493 }
 0x3ff   :  { %v496_v11 = vmul.f32 %v2391_v4, %v494_v8  ;;  %v395_v12 = vpop.permute.xlu0 %394 }
 0x400   :  { %v397_v13 = vmul.f32 %v2393_v10, %v395_v12 }
 0x401   :  { %498 = vrot.lane.b32.xlu1 %v496_v11, %s2519_s21 }
 0x402   :  { %399 = vrot.lane.b32.xlu0 %v397_v13, %s2519_s21 }
 0x473   :  { %v499_v15 = vpop.permute.xlu1 %498 }
 0x474   :  { %v2772_v17 = vadd.f32 %v499_v15, %v491_v14  ;;  %v400_v18 = vpop.permute.xlu0 %399 }
 0x475   :  { %v2774_v19 = vadd.f32 %v400_v18, %v392_v16 }
 0x476   :  { %2394 = vtanh.f32 %v2772_v17 }
 0x477   :  { %2396 = vtanh.f32 %v2774_v19 }
 0x483   :  { %v2395_v20 = vpop.eup %2394 }
 0x484   :  { %v2397_v21 = vpop.eup %2396  ;;  %504 = vrot.lane.b32.xlu1 %v2395_v20, %s2518_s20 }
 0x485   :  { %405 = vrot.lane.b32.xlu0 %v2397_v21, %s2518_s20  ;;  %v168_v21 = vadd.f32 %v2747_v44, %v2624_v9 }
 0x4f6   :  { %v505_v22 = vpop.permute.xlu1 %504 }
 0x4f7   :  { %v507_v23 = vmul.f32 %v2391_v4, %v505_v22  ;;  %v406_v24 = vpop.permute.xlu0 %405 }
 0x4f8   :  { %v408_v25 = vmul.f32 %v2393_v10, %v406_v24 }
 0x4f9   :  { %509 = vrot.lane.b32.xlu0 %v507_v23, %s2519_s21 }
 0x4fa   :  { %513 = vrot.lane.b32.xlu1 %v408_v25, %s2518_s20 }
 0x56b   :  { %v510_v26 = vpop.permute.xlu0 %509 }
 0x56c   :  { %v514_v29 = vpop.permute.xlu1 %513  ;;  %2188 = vmatmul.mubr.msk.f32.vlgmr.msra.gmra.mxu0 %vm207_vm3, %v510_v26 }
 0x56d   :  { %v516_v31 = vsel %vm207_vm3, %v510_v26, %v514_v29  ;;  %2191 = vmatpush3.msra.mxu0 %v2641_v27  ;;  %2206 = vmatprep.mubr.msk.f32.mxu0 %vm2517_vm2, %v2516_v0 }
 0x56e   :  { %2177 = vmatmul.mubr.msk.f32.vlgmr.msra.gmra.mxu1 %vm311_vm4, %v516_v31  ;;  %2192 = vmatprep.subr.mxu0 %v2516_v0 }
 0x56f   :  { %2193 = vmatpush3.msra.mxu0 %v2647_v28  ;;  %2210 = vmatpush3.msra.mxu1 %v2572_v2 }
 0x570   :  { %2194 = vmatprep.subr.mxu0 %v2516_v0  ;;  %2211 = vmatprep.subr.mxu1 %v2516_v0 }
 0x571   :  { %2195 = vmatpush3.msra.mxu0 %v2658_v30  ;;  %2212 = vmatpush3.msra.mxu1 %v2586_v5 }
 0x572   :  { %2196 = vmatprep.subr.mxu0 %v2516_v0  ;;  %2213 = vmatprep.subr.mxu1 %v2516_v0 }
 0x573   :  { %2197 = vmatpush3.msra.mxu0 %v2669_v32  ;;  %2214 = vmatpush3.msra.mxu1 %v2594_v6 }
 0x574   :  { %2198 = vmatprep.subr.mxu0 %v2516_v0  ;;  %2215 = vmatprep.subr.mxu1 %v2516_v0 }
 0x575   :  { %2199 = vmatpush3.msra.mxu0 %v2680_v34  ;;  %2216 = vmatpush3.msra.mxu1 %v2602_v7 }
 0x576   :  { %2200 = vmatprep.subr.mxu0 %v2516_v0  ;;  %2217 = vmatprep.mubr.msk.f32.mxu1 %vm2517_vm2, %v2516_v0 }
 0x577   :  { %2201 = vmatpush3.msra.mxu0 %v2692_v37  ;;  %2220 = vmatprep.subr.mxu1 %v2516_v0 }
 0x578   :  { %2202 = vmatprep.subr.mxu0 %v2516_v0 }
 0x579   :  { %2203 = vmatpush3.msra.mxu0 %v2700_v38 }
 0x57a   :  { %2204 = vmatprep.subr.mxu0 %v2516_v0 }
 0x57b   :  { %2205 = vmatpush3.msra.mxu0 %v2709_v39 }
 0x57c   :  { %2239 = vmatprep.subr.mxu0 %v2516_v0 }
 0x62c   :  { %v684_v35 = vpop.f32.mrf.mxu0 }
 0x62d   :  { %v688_v36 = vadd.f32 %v684_v35, %v163_v33 }
 0x62e   :  { %v586_v40 = vpop.f32.mrf.mxu1  ;;  %v2189_v41 = vpop.f32.mrf.mxu0 }
 0x62f   :  { %2398 = vtanh.f32 %v688_v36  ;;  %v587_v42 = vadd.f32 %v2764_v51, %v586_v40  ;;  %v1954_v53 = vmul.f32 -1.442695, %v688_v36 }
 0x630   :  { %v2178_v43 = vpop.f32.mrf.mxu1 }
 0x631   :  { %2400 = vtanh.f32 %v587_v42  ;;  %v1952_v54 = vmul.f32 -1.442695, %v587_v42 }
 0x632   :  { %2402 = vpow2.f32 %v1954_v53 }
 0x633   :  { %2404 = vpow2.f32 %v1952_v54 }
 0x63c   :  { %v2399_v49 = vpop.eup %2398 }
 0x63d   :  { %698 = vrot.lane.b32.xlu1 %v2399_v49, %s2518_s20 }
 0x63e   :  { %v2401_v52 = vpop.eup %2400 }
 0x63f   :  { %599 = vrot.lane.b32.xlu0 %v2401_v52, %s2518_s20  ;;  %v2403_v45 = vpop.eup %2402 }
 0x640   :  { %v2405_v55 = vpop.eup %2404  ;;  %v692_v56 = vadd.f32 1.0, %v2403_v45 }
 0x641   :  { %v593_v57 = vadd.f32 1.0, %v2405_v55 }
 0x642   :  { %2406 = vrcp.f32 %v692_v56 }
 0x643   :  { %2408 = vrcp.f32 %v593_v57 }
 0x64f   :  { %v2407_v58 = vpop.eup %2406 }
 0x650   :  { %v2409_v61 = vpop.eup %2408  ;;  %v696_v1 = vmul.f32 %v2407_v58, %v2772_v17 }
 0x651   :  { %v597_v8 = vmul.f32 %v2409_v61, %v2774_v19 }
 0x6af   :  { %v699_v59 = vpop.permute.xlu1 %698 }
 0x6b0   :  { %v701_v60 = vmul.f32 %v2407_v58, %v699_v59 }
 0x6b1   :  { %v600_v62 = vpop.permute.xlu0 %599 }
 0x6b2   :  { %703 = vrot.lane.b32.xlu1 %v701_v60, %s2519_s21  ;;  %v602_v63 = vmul.f32 %v2409_v61, %v600_v62 }
 0x6b4   :  { %604 = vrot.lane.b32.xlu0 %v602_v63, %s2519_s21 }
 0x724   :  { %v704_v3 = vpop.permute.xlu1 %703 }
 0x725   :  { %v2821_v4 = vadd.f32 %v704_v3, %v696_v1 }
 0x726   :  { %v605_v10 = vpop.permute.xlu0 %604 }
 0x727   :  { %2410 = vtanh.f32 %v2821_v4  ;;  %v2825_v11 = vadd.f32 %v605_v10, %v597_v8 }
 0x729   :  { %2412 = vtanh.f32 %v2825_v11 }
 0x734   :  { %v2411_v12 = vpop.eup %2410 }
 0x735   :  { %709 = vrot.lane.b32.xlu1 %v2411_v12, %s2518_s20  ;;  %v173_v12 = vadd.f32 %v2624_v9, %v2753_v47 }
 0x736   :  { %v2413_v13 = vpop.eup %2412 }
 0x737   :  { %610 = vrot.lane.b32.xlu0 %v2413_v13, %s2518_s20 }
 0x7a7   :  { %v710_v14 = vpop.permute.xlu1 %709 }
 0x7a8   :  { %v712_v15 = vmul.f32 %v2407_v58, %v710_v14 }
 0x7a9   :  { %v611_v16 = vpop.permute.xlu0 %610 }
 0x7aa   :  { %714 = vrot.lane.b32.xlu0 %v712_v15, %s2519_s21  ;;  %v613_v17 = vmul.f32 %v2409_v61, %v611_v16 }
 0x7ac   :  { %718 = vrot.lane.b32.xlu1 %v613_v17, %s2518_s20 }
 0x81c   :  { %v715_v18 = vpop.permute.xlu0 %714 }
 0x81d   :  { %2218 = vmatmul.mubr.msk.f32.vlgmr.msra.gmra.mxu1 %vm207_vm3, %v715_v18 }
 0x81e   :  { %2221 = vmatpush3.msra.mxu1 %v2641_v27  ;;  %2236 = vmatprep.mubr.msk.f32.mxu1 %vm2517_vm2, %v2516_v0  ;;  %v719_v19 = vpop.permute.xlu1 %718 }
 0x81f   :  { %2222 = vmatprep.subr.mxu1 %v2516_v0  ;;  %v721_v20 = vsel %vm207_vm3, %v715_v18, %v719_v19 }
 0x820   :  { %2223 = vmatpush3.msra.mxu1 %v2647_v28  ;;  %2207 = vmatmul.mubr.msk.f32.vlgmr.msra.gmra.mxu0 %vm311_vm4, %v721_v20 }
 0x821   :  { %2224 = vmatprep.subr.mxu1 %v2516_v0  ;;  %2240 = vmatpush3.msra.mxu0 %v2572_v2 }
 0x822   :  { %2225 = vmatpush3.msra.mxu1 %v2658_v30  ;;  %2241 = vmatprep.subr.mxu0 %v2516_v0 }
 0x823   :  { %2226 = vmatprep.subr.mxu1 %v2516_v0  ;;  %2242 = vmatpush3.msra.mxu0 %v2586_v5 }
 0x824   :  { %2227 = vmatpush3.msra.mxu1 %v2669_v32  ;;  %2243 = vmatprep.subr.mxu0 %v2516_v0 }
 0x825   :  { %2228 = vmatprep.subr.mxu1 %v2516_v0  ;;  %2244 = vmatpush3.msra.mxu0 %v2594_v6 }
 0x826   :  { %2229 = vmatpush3.msra.mxu1 %v2680_v34  ;;  %2245 = vmatprep.subr.mxu0 %v2516_v0 }
 0x827   :  { %2230 = vmatprep.subr.mxu1 %v2516_v0  ;;  %2246 = vmatpush3.msra.mxu0 %v2602_v7 }
 0x828   :  { %2231 = vmatpush3.msra.mxu1 %v2692_v37  ;;  %2247 = vmatprep.mubr.msk.f32.mxu0 %vm2517_vm2, %v2516_v0 }
 0x829   :  { %2232 = vmatprep.subr.mxu1 %v2516_v0  ;;  %2250 = vmatprep.subr.mxu0 %v2516_v0 }
 0x82a   :  { %2233 = vmatpush3.msra.mxu1 %v2700_v38 }
 0x82b   :  { %2234 = vmatprep.subr.mxu1 %v2516_v0 }
 0x82c   :  { %2235 = vmatpush3.msra.mxu1 %v2709_v39 }
 0x82d   :  { %2269 = vmatprep.subr.mxu1 %v2516_v0 }
 0x8dd   :  { %v889_v22 = vpop.f32.mrf.mxu1 }
 0x8de   :  { %v893_v23 = vadd.f32 %v889_v22, %v168_v21 }
 0x8df   :  { %v2219_v24 = vpop.f32.mrf.mxu1 }
 0x8e0   :  { %2414 = vtanh.f32 %v893_v23  ;;  %v791_v25 = vpop.f32.mrf.mxu0  ;;  %v1958_v35 = vmul.f32 -1.442695, %v893_v23 }
 0x8e1   :  { %v792_v26 = vadd.f32 %v2764_v51, %v791_v25 }
 0x8e2   :  { %v2208_v29 = vpop.f32.mrf.mxu0 }
 0x8e3   :  { %2416 = vtanh.f32 %v792_v26  ;;  %v1956_v36 = vmul.f32 -1.442695, %v792_v26 }
 0x8e4   :  { %2418 = vpow2.f32 %v1958_v35 }
 0x8e5   :  { %2420 = vpow2.f32 %v1956_v36 }
 0x8ed   :  { %v2415_v31 = vpop.eup %2414 }
 0x8ee   :  { %903 = vrot.lane.b32.xlu1 %v2415_v31, %s2518_s20 }
 0x8f0   :  { %v2417_v33 = vpop.eup %2416 }
 0x8f1   :  { %804 = vrot.lane.b32.xlu0 %v2417_v33, %s2518_s20  ;;  %v2419_v44 = vpop.eup %2418 }
 0x8f2   :  { %v897_v40 = vadd.f32 1.0, %v2419_v44  ;;  %v2421_v41 = vpop.eup %2420 }
 0x8f3   :  { %v798_v42 = vadd.f32 1.0, %v2421_v41 }
 0x8f4   :  { %2422 = vrcp.f32 %v897_v40 }
 0x8f5   :  { %2424 = vrcp.f32 %v798_v42 }
 0x901   :  { %v2423_v43 = vpop.eup %2422 }
 0x902   :  { %v2425_v53 = vpop.eup %2424  ;;  %v901_v55 = vmul.f32 %v2423_v43, %v2821_v4 }
 0x903   :  { %v802_v58 = vmul.f32 %v2425_v53, %v2825_v11 }
 0x960   :  { %v904_v49 = vpop.permute.xlu1 %903 }
 0x961   :  { %v906_v52 = vmul.f32 %v2423_v43, %v904_v49 }
 0x963   :  { %908 = vrot.lane.b32.xlu1 %v906_v52, %s2519_s21  ;;  %v805_v54 = vpop.permute.xlu0 %804 }
 0x964   :  { %v807_v45 = vmul.f32 %v2425_v53, %v805_v54 }
 0x966   :  { %809 = vrot.lane.b32.xlu0 %v807_v45, %s2519_s21 }
 0x9d5   :  { %v909_v56 = vpop.permute.xlu1 %908 }
 0x9d6   :  { %v2871_v57 = vadd.f32 %v909_v56, %v901_v55 }
 0x9d8   :  { %2426 = vtanh.f32 %v2871_v57  ;;  %v810_v59 = vpop.permute.xlu0 %809 }
 0x9d9   :  { %v2875_v60 = vadd.f32 %v810_v59, %v802_v58 }
 0x9db   :  { %2428 = vtanh.f32 %v2875_v60 }
 0x9e5   :  { %v2427_v61 = vpop.eup %2426 }
 0x9e6   :  { %914 = vrot.lane.b32.xlu1 %v2427_v61, %s2518_s20 }
 0x9e8   :  { %v2429_v62 = vpop.eup %2428 }
 0x9e9   :  { %815 = vrot.lane.b32.xlu0 %v2429_v62, %s2518_s20 }
 0xa58   :  { %v915_v63 = vpop.permute.xlu1 %914 }
 0xa59   :  { %v917_v1 = vmul.f32 %v2423_v43, %v915_v63 }
 0xa5b   :  { %919 = vrot.lane.b32.xlu0 %v917_v1, %s2519_s21  ;;  %v816_v3 = vpop.permute.xlu0 %815 }
 0xa5c   :  { %v818_v4 = vmul.f32 %v2425_v53, %v816_v3 }
 0xa5e   :  { %923 = vrot.lane.b32.xlu1 %v818_v4, %s2518_s20 }
 0xacd   :  { %v920_v8 = vpop.permute.xlu0 %919 }
 0xace   :  { %2248 = vmatmul.mubr.msk.f32.vlgmr.msra.gmra.mxu0 %vm207_vm3, %v920_v8 }
 0xacf   :  { %2251 = vmatpush3.msra.mxu0 %v2641_v27  ;;  %2266 = vmatprep.mubr.msk.f32.mxu0 %vm2517_vm2, %v2516_v0 }
 0xad0   :  { %2252 = vmatprep.subr.mxu0 %v2516_v0  ;;  %v924_v10 = vpop.permute.xlu1 %923 }
 0xad1   :  { %2253 = vmatpush3.msra.mxu0 %v2647_v28  ;;  %v926_v11 = vsel %vm207_vm3, %v920_v8, %v924_v10 }
 0xad2   :  { %2254 = vmatprep.subr.mxu0 %v2516_v0  ;;  %2237 = vmatmul.mubr.msk.f32.vlgmr.msra.gmra.mxu1 %vm311_vm4, %v926_v11 }
 0xad3   :  { %2255 = vmatpush3.msra.mxu0 %v2658_v30  ;;  %2270 = vmatpush3.msra.mxu1 %v2572_v2 }
 0xad4   :  { %2256 = vmatprep.subr.mxu0 %v2516_v0  ;;  %2271 = vmatprep.subr.mxu1 %v2516_v0 }
 0xad5   :  { %2257 = vmatpush3.msra.mxu0 %v2669_v32  ;;  %2272 = vmatpush3.msra.mxu1 %v2586_v5 }
 0xad6   :  { %2258 = vmatprep.subr.mxu0 %v2516_v0  ;;  %2273 = vmatprep.subr.mxu1 %v2516_v0 }
 0xad7   :  { %2259 = vmatpush3.msra.mxu0 %v2680_v34  ;;  %2274 = vmatpush3.msra.mxu1 %v2594_v6 }
 0xad8   :  { %2260 = vmatprep.subr.mxu0 %v2516_v0  ;;  %2275 = vmatprep.subr.mxu1 %v2516_v0 }
 0xad9   :  { %2277 = vmatprep.mubr.msk.f32.mxu1 %vm2517_vm2, %v2516_v0  ;;  %2276 = vmatpush3.msra.mxu1 %v2602_v7 }
 0xada   :  { %2261 = vmatpush3.msra.mxu0 %v2692_v37  ;;  %2280 = vmatprep.subr.mxu1 %v2516_v0 }
 0xadb   :  { %2262 = vmatprep.subr.mxu0 %v2516_v0 }
 0xadc   :  { %2263 = vmatpush3.msra.mxu0 %v2700_v38 }
 0xadd   :  { %2264 = vmatprep.subr.mxu0 %v2516_v0 }
 0xade   :  { %2265 = vmatpush3.msra.mxu0 %v2709_v39 }
 0xadf   :  { %2299 = vmatprep.subr.mxu0 %v2516_v0 }
 0xb8e   :  { %v1094_v13 = vpop.f32.mrf.mxu0 }
 0xb8f   :  { %v1098_v14 = vadd.f32 %v1094_v13, %v173_v12 }
 0xb90   :  { %v2249_v15 = vpop.f32.mrf.mxu0 }
 0xb91   :  { %2430 = vtanh.f32 %v1098_v14  ;;  %v1962_v21 = vmul.f32 -1.442695, %v1098_v14 }
 0xb92   :  { %v996_v16 = vpop.f32.mrf.mxu1 }
 0xb93   :  { %v997_v17 = vadd.f32 %v2764_v51, %v996_v16 }
 0xb94   :  { %v2238_v18 = vpop.f32.mrf.mxu1 }
 0xb95   :  { %2432 = vtanh.f32 %v997_v17  ;;  %v1960_v22 = vmul.f32 -1.442695, %v997_v17 }
 0xb96   :  { %2434 = vpow2.f32 %v1962_v21 }
 0xb97   :  { %2436 = vpow2.f32 %v1960_v22 }
 0xb9e   :  { %v2431_v19 = vpop.eup %2430 }
 0xb9f   :  { %1108 = vrot.lane.b32.xlu1 %v2431_v19, %s2518_s20 }
 0xba2   :  { %v2433_v20 = vpop.eup %2432 }
 0xba3   :  { %1009 = vrot.lane.b32.xlu0 %v2433_v20, %s2518_s20  ;;  %v2435_v47 = vpop.eup %2434 }
 0xba4   :  { %v1102_v23 = vadd.f32 1.0, %v2435_v47  ;;  %v2437_v24 = vpop.eup %2436 }
 0xba5   :  { %v1003_v25 = vadd.f32 1.0, %v2437_v24 }
 0xba6   :  { %2438 = vrcp.f32 %v1102_v23 }
 0xba7   :  { %2440 = vrcp.f32 %v1003_v25 }
 0xbb3   :  { %v2439_v26 = vpop.eup %2438 }
 0xbb4   :  { %v2441_v33 = vpop.eup %2440  ;;  %v1106_v44 = vmul.f32 %v2439_v26, %v2871_v57 }
 0xbb5   :  { %v1007_v42 = vmul.f32 %v2441_v33, %v2875_v60 }
 0xc11   :  { %v1109_v29 = vpop.permute.xlu1 %1108 }
 0xc12   :  { %v1111_v31 = vmul.f32 %v2439_v26, %v1109_v29 }
 0xc14   :  { %1113 = vrot.lane.b32.xlu1 %v1111_v31, %s2519_s21 }
 0xc15   :  { %v1010_v35 = vpop.permute.xlu0 %1009 }
 0xc16   :  { %v1012_v36 = vmul.f32 %v2441_v33, %v1010_v35 }
 0xc18   :  { %1014 = vrot.lane.b32.xlu0 %v1012_v36, %s2519_s21 }
 0xc86   :  { %v1114_v40 = vpop.permute.xlu1 %1113 }
 0xc87   :  { %v2921_v41 = vadd.f32 %v1114_v40, %v1106_v44 }
 0xc89   :  { %2442 = vtanh.f32 %v2921_v41 }
 0xc8a   :  { %v1015_v43 = vpop.permute.xlu0 %1014 }
 0xc8b   :  { %v2925_v49 = vadd.f32 %v1015_v43, %v1007_v42 }
 0xc8d   :  { %2444 = vtanh.f32 %v2925_v49 }
 0xc96   :  { %v2443_v52 = vpop.eup %2442 }
 0xc97   :  { %1119 = vrot.lane.b32.xlu1 %v2443_v52, %s2518_s20 }
 0xc9a   :  { %v2445_v53 = vpop.eup %2444 }
 0xc9b   :  { %1020 = vrot.lane.b32.xlu0 %v2445_v53, %s2518_s20 }
 0xd09   :  { %v1120_v54 = vpop.permute.xlu1 %1119 }
 0xd0a   :  { %v1122_v45 = vmul.f32 %v2439_v26, %v1120_v54 }
 0xd0c   :  { %1124 = vrot.lane.b32.xlu0 %v1122_v45, %s2519_s21 }
 0xd0d   :  { %v1021_v55 = vpop.permute.xlu0 %1020 }
 0xd0e   :  { %v1023_v56 = vmul.f32 %v2441_v33, %v1021_v55 }
 0xd10   :  { %1128 = vrot.lane.b32.xlu1 %v1023_v56, %s2518_s20 }
 0xd7e   :  { %v1125_v57 = vpop.permute.xlu0 %1124 }
 0xd7f   :  { %2278 = vmatmul.mubr.msk.f32.vlgmr.msra.gmra.mxu1 %vm207_vm3, %v1125_v57 }
 0xd80   :  { %2281 = vmatpush3.msra.mxu1 %v2641_v27  ;;  %2296 = vmatprep.mubr.msk.f32.mxu1 %vm2517_vm2, %v2516_v0 }
 0xd81   :  { %2282 = vmatprep.subr.mxu1 %v2516_v0 }
 0xd82   :  { %2283 = vmatpush3.msra.mxu1 %v2647_v28  ;;  %v1129_v58 = vpop.permute.xlu1 %1128 }
 0xd83   :  { %2284 = vmatprep.subr.mxu1 %v2516_v0  ;;  %v1131_v59 = vsel %vm207_vm3, %v1125_v57, %v1129_v58 }
 0xd84   :  { %2285 = vmatpush3.msra.mxu1 %v2658_v30  ;;  %2267 = vmatmul.mubr.msk.f32.vlgmr.msra.gmra.mxu0 %vm311_vm4, %v1131_v59 }
 0xd85   :  { %2286 = vmatprep.subr.mxu1 %v2516_v0  ;;  %2300 = vmatpush3.msra.mxu0 %v2572_v2  ;;  %v178_v2 = vadd.f32 %v2751_v46, %v2624_v9 }
 0xd86   :  { %2287 = vmatpush3.msra.mxu1 %v2669_v32  ;;  %2301 = vmatprep.subr.mxu0 %v2516_v0 }
 0xd87   :  { %2288 = vmatprep.subr.mxu1 %v2516_v0  ;;  %2302 = vmatpush3.msra.mxu0 %v2586_v5 }
 0xd88   :  { %2289 = vmatpush3.msra.mxu1 %v2680_v34  ;;  %2303 = vmatprep.subr.mxu0 %v2516_v0 }
 0xd89   :  { %2307 = vmatprep.mubr.msk.f32.mxu0 %vm2517_vm2, %v2516_v0  ;;  %2304 = vmatpush3.msra.mxu0 %v2594_v6 }
 0xd8a   :  { %2290 = vmatprep.subr.mxu1 %v2516_v0  ;;  %2305 = vmatprep.subr.mxu0 %v2516_v0 }
 0xd8b   :  { %2291 = vmatpush3.msra.mxu1 %v2692_v37  ;;  %2306 = vmatpush3.msra.mxu0 %v2602_v7 }
 0xd8c   :  { %2292 = vmatprep.subr.mxu1 %v2516_v0  ;;  %2310 = vmatprep.subr.mxu0 %v2516_v0 }
 0xd8d   :  { %2293 = vmatpush3.msra.mxu1 %v2700_v38 }
 0xd8e   :  { %2294 = vmatprep.subr.mxu1 %v2516_v0 }
 0xd8f   :  { %2295 = vmatpush3.msra.mxu1 %v2709_v39 }
 0xd90   :  { %2329 = vmatprep.subr.mxu1 %v2516_v0 }
 0xe3f   :  { %v1299_v5 = vpop.f32.mrf.mxu1 }
 0xe40   :  { %v1303_v6 = vadd.f32 %v1299_v5, %v178_v2 }
 0xe41   :  { %v2279_v60 = vpop.f32.mrf.mxu1 }
 0xe42   :  { %2446 = vtanh.f32 %v1303_v6  ;;  %v1966_v3 = vmul.f32 -1.442695, %v1303_v6 }
 0xe44   :  { %v1201_v7 = vpop.f32.mrf.mxu0 }
 0xe45   :  { %v1202_v61 = vadd.f32 %v2764_v51, %v1201_v7 }
 0xe46   :  { %v2268_v62 = vpop.f32.mrf.mxu0 }
 0xe47   :  { %2448 = vtanh.f32 %v1202_v61  ;;  %v1964_v4 = vmul.f32 -1.442695, %v1202_v61 }
 0xe48   :  { %2450 = vpow2.f32 %v1966_v3 }
 0xe49   :  { %2452 = vpow2.f32 %v1964_v4 }
 0xe4f   :  { %v2447_v63 = vpop.eup %2446 }
 0xe50   :  { %1313 = vrot.lane.b32.xlu1 %v2447_v63, %s2518_s20 }
 0xe54   :  { %v2449_v1 = vpop.eup %2448 }
 0xe55   :  { %1214 = vrot.lane.b32.xlu0 %v2449_v1, %s2518_s20  ;;  %v2451_v46 = vpop.eup %2450 }
 0xe56   :  { %v1307_v8 = vadd.f32 1.0, %v2451_v46  ;;  %v2453_v10 = vpop.eup %2452 }
 0xe57   :  { %v1208_v11 = vadd.f32 1.0, %v2453_v10  ;;  %v2506_v10 = vld [vmem:[%s3128_s3 + $0x38] sm:$0xff] }
 0xe58   :  { %2454 = vrcp.f32 %v1307_v8 }
 0xe59   :  { %2456 = vrcp.f32 %v1208_v11  ;;  %v2507_v11 = vld [vmem:[%s3128_s3 + $0x30] sm:$0xff] }
 0xe65   :  { %v2455_v12 = vpop.eup %2454 }
 0xe66   :  { %v2457_v15 = vpop.eup %2456  ;;  %v1311_v18 = vmul.f32 %v2455_v12, %v2921_v41 }
 0xe67   :  { %v1212_v21 = vmul.f32 %v2457_v15, %v2925_v49 }
 0xec2   :  { %v1314_v13 = vpop.permute.xlu1 %1313 }
 0xec3   :  { %v1316_v14 = vmul.f32 %v2455_v12, %v1314_v13 }
 0xec5   :  { %1318 = vrot.lane.b32.xlu1 %v1316_v14, %s2519_s21 }
 0xec7   :  { %v1215_v16 = vpop.permute.xlu0 %1214 }
 0xec8   :  { %v1217_v17 = vmul.f32 %v2457_v15, %v1215_v16  ;;  %v2510_v16 = vld [vmem:[%s3128_s3 + $0x18] sm:$0xff] }
 0xeca   :  { %1219 = vrot.lane.b32.xlu0 %v1217_v17, %s2519_s21  ;;  %v2511_v17 = vld [vmem:[%s3128_s3 + $0x10] sm:$0xff] }
 0xf37   :  { %v1319_v19 = vpop.permute.xlu1 %1318 }
 0xf38   :  { %v2971_v20 = vadd.f32 %v1319_v19, %v1311_v18  ;;  %v2512_v18 = vld [vmem:[%s3128_s3 + $0x8] sm:$0xff]  ;;  %v2513_v19 = vld [vmem:[%s3128_s3] sm:$0xff] }
 0xf3a   :  { %2458 = vtanh.f32 %v2971_v20 }
 0xf3c   :  { %v1220_v22 = vpop.permute.xlu0 %1219 }
 0xf3d   :  { %v2975_v47 = vadd.f32 %v1220_v22, %v1212_v21 }
 0xf3f   :  { %2460 = vtanh.f32 %v2975_v47 }
 0xf47   :  { %v2459_v23 = vpop.eup %2458 }
 0xf48   :  { %1324 = vrot.lane.b32.xlu1 %v2459_v23, %s2518_s20 }
 0xf4c   :  { %v2461_v24 = vpop.eup %2460 }
 0xf4d   :  { %1225 = vrot.lane.b32.xlu0 %v2461_v24, %s2518_s20 }
 0xfba   :  { %v1325_v25 = vpop.permute.xlu1 %1324 }
 0xfbb   :  { %v1327_v26 = vmul.f32 %v2455_v12, %v1325_v25  ;;  %v2508_v12 = vld [vmem:[%s3128_s3 + $0x28] sm:$0xff] }
 0xfbd   :  { %1329 = vrot.lane.b32.xlu0 %v1327_v26, %s2519_s21 }
 0xfbf   :  { %v1226_v29 = vpop.permute.xlu0 %1225 }
 0xfc0   :  { %v1228_v31 = vmul.f32 %v2457_v15, %v1226_v29  ;;  %v2509_v15 = vld [vmem:[%s3128_s3 + $0x20] sm:$0xff] }
 0xfc2   :  { %1333 = vrot.lane.b32.xlu1 %v1228_v31, %s2518_s20 }
0x102f   :  { %v1330_v33 = vpop.permute.xlu0 %1329 }
0x1030   :  { %2308 = vmatmul.mubr.msk.f32.vlgmr.msra.gmra.mxu0 %vm207_vm3, %v1330_v33 }
0x1031   :  { %2311 = vmatpush3.msra.mxu0 %v2641_v27  ;;  %2326 = vmatprep.mubr.msk.f32.mxu0 %vm2517_vm2, %v2516_v0  ;;  %v2502_v27 = vld [vmem:[%s3125_s2 + $0x18] sm:$0xff] }
0x1032   :  { %2312 = vmatprep.subr.mxu0 %v2516_v0 }
0x1033   :  { %2313 = vmatpush3.msra.mxu0 %v2647_v28  ;;  %v2503_v28 = vld [vmem:[%s3125_s2 + $0x10] sm:$0xff] }
0x1034   :  { %2314 = vmatprep.subr.mxu0 %v2516_v0  ;;  %v1334_v35 = vpop.permute.xlu1 %1333 }
0x1035   :  { %2315 = vmatpush3.msra.mxu0 %v2658_v30  ;;  %v1336_v36 = vsel %vm207_vm3, %v1330_v33, %v1334_v35  ;;  %v2504_v30 = vld [vmem:[%s3125_s2 + $0x8] sm:$0xff] }
0x1036   :  { %2316 = vmatprep.subr.mxu0 %v2516_v0  ;;  %2297 = vmatmul.mubr.msk.f32.vlgmr.msra.gmra.mxu1 %vm311_vm4, %v1336_v36 }
0x1037   :  { %2317 = vmatpush3.msra.mxu0 %v2669_v32  ;;  %2330 = vmatpush3.msra.mxu1 %v2502_v27  ;;  %v2505_v32 = vld [vmem:[%s3125_s2] sm:$0xff] }
0x1038   :  { %2318 = vmatprep.subr.mxu0 %v2516_v0  ;;  %2331 = vmatprep.subr.mxu1 %v2516_v0 }
0x1039   :  { %2337 = vmatprep.mubr.msk.f32.mxu1 %vm2517_vm2, %v2516_v0  ;;  %2332 = vmatpush3.msra.mxu1 %v2503_v28 }
0x103a   :  { %2319 = vmatpush3.msra.mxu0 %v2680_v34  ;;  %2333 = vmatprep.subr.mxu1 %v2516_v0  ;;  %v183_v34 = vadd.f32 %v2624_v9, %v2759_v50 }
0x103b   :  { %2320 = vmatprep.subr.mxu0 %v2516_v0  ;;  %2334 = vmatpush3.msra.mxu1 %v2504_v30 }
0x103c   :  { %2321 = vmatpush3.msra.mxu0 %v2692_v37  ;;  %2335 = vmatprep.subr.mxu1 %v2516_v0 }
0x103d   :  { %2322 = vmatprep.subr.mxu0 %v2516_v0  ;;  %2336 = vmatpush3.msra.mxu1 %v2505_v32 }
0x103e   :  { %2323 = vmatpush3.msra.mxu0 %v2700_v38  ;;  %2340 = vmatprep.subr.mxu1 %v2516_v0 }
0x103f   :  { %2324 = vmatprep.subr.mxu0 %v2516_v0 }
0x1040   :  { %2325 = vmatpush3.msra.mxu0 %v2709_v39 }
0x1041   :  { %2359 = vmatprep.subr.mxu0 %v2516_v0 }
0x10f0   :  { %v1504_v37 = vpop.f32.mrf.mxu0 }
0x10f1   :  { %v1508_v44 = vadd.f32 %v1504_v37, %v183_v34 }
0x10f2   :  { %v2309_v40 = vpop.f32.mrf.mxu0 }
0x10f3   :  { %2462 = vtanh.f32 %v1508_v44  ;;  %v1970_v39 = vmul.f32 -1.442695, %v1508_v44 }
0x10f6   :  { %v1406_v41 = vpop.f32.mrf.mxu1 }
0x10f7   :  { %v1407_v42 = vadd.f32 %v2764_v51, %v1406_v41 }
0x10f8   :  { %v2298_v43 = vpop.f32.mrf.mxu1 }
0x10f9   :  { %2464 = vtanh.f32 %v1407_v42  ;;  %v1968_v52 = vmul.f32 -1.442695, %v1407_v42 }
0x10fa   :  { %2466 = vpow2.f32 %v1970_v39 }
0x10fb   :  { %2468 = vpow2.f32 %v1968_v52 }
0x1100   :  { %v2463_v38 = vpop.eup %2462 }
0x1101   :  { %1518 = vrot.lane.b32.xlu1 %v2463_v38, %s2518_s20 }
0x1106   :  { %v2465_v49 = vpop.eup %2464 }
0x1107   :  { %1419 = vrot.lane.b32.xlu0 %v2465_v49, %s2518_s20  ;;  %v2467_v9 = vpop.eup %2466 }
0x1108   :  { %v1512_v50 = vadd.f32 1.0, %v2467_v9  ;;  %v2469_v53 = vpop.eup %2468 }
0x1109   :  { %v1413_v54 = vadd.f32 1.0, %v2469_v53 }
0x110a   :  { %2470 = vrcp.f32 %v1512_v50 }
0x110b   :  { %2472 = vrcp.f32 %v1413_v54 }
0x1117   :  { %v2471_v45 = vpop.eup %2470 }
0x1118   :  { %v2473_v57 = vpop.eup %2472  ;;  %v1516_v2 = vmul.f32 %v2471_v45, %v2971_v20  ;;  %v2514_v20 = vld [vmem:[%s3127_s4] ss:$0 sm:$0xff] }
0x1119   :  { %v1417_v60 = vmul.f32 %v2473_v57, %v2975_v47  ;;  %v188_v21 = vadd.f32 %v2514_v20, %v2755_v48 }
0x1173   :  { %v1519_v55 = vpop.permute.xlu1 %1518 }
0x1174   :  { %v1521_v56 = vmul.f32 %v2471_v45, %v1519_v55 }
0x1176   :  { %1523 = vrot.lane.b32.xlu1 %v1521_v56, %s2519_s21 }
0x1179   :  { %v1420_v58 = vpop.permute.xlu0 %1419 }
0x117a   :  { %v1422_v59 = vmul.f32 %v2473_v57, %v1420_v58  ;;  %v2515_v58 = vld [vmem:[%s3129_s5] ss:$0 sm:$0xff] }
0x117c   :  { %1424 = vrot.lane.b32.xlu0 %v1422_v59, %s2519_s21 }
0x11e8   :  { %v1524_v5 = vpop.permute.xlu1 %1523 }
0x11e9   :  { %v3029_v6 = vadd.f32 %v1524_v5, %v1516_v2 }
0x11eb   :  { %2474 = vtanh.f32 %v3029_v6 }
0x11ee   :  { %v1425_v7 = vpop.permute.xlu0 %1424 }
0x11ef   :  { %v3033_v61 = vadd.f32 %v1425_v7, %v1417_v60 }
0x11f1   :  { %2476 = vtanh.f32 %v3033_v61 }
0x11f8   :  { %v2475_v62 = vpop.eup %2474 }
0x11f9   :  { %1529 = vrot.lane.b32.xlu1 %v2475_v62, %s2518_s20 }
0x11fe   :  { %v2477_v63 = vpop.eup %2476 }
0x11ff   :  { %1430 = vrot.lane.b32.xlu0 %v2477_v63, %s2518_s20 }
0x126b   :  { %v1530_v1 = vpop.permute.xlu1 %1529 }
0x126c   :  { %v1532_v3 = vmul.f32 %v2471_v45, %v1530_v1 }
0x126e   :  { %1534 = vrot.lane.b32.xlu0 %v1532_v3, %s2519_s21 }
0x1271   :  { %v1431_v4 = vpop.permute.xlu0 %1430 }
0x1272   :  { %v1433_v46 = vmul.f32 %v2473_v57, %v1431_v4 }
0x1274   :  { %1538 = vrot.lane.b32.xlu1 %v1433_v46, %s2518_s20  ;;  %v1847_v46 = vld [vmem:[%s3130_s6 + $0x18] sm:$0xff] }
0x12e0   :  { %v1535_v8 = vpop.permute.xlu0 %1534 }
0x12e1   :  { %2338 = vmatmul.mubr.msk.f32.vlgmr.msra.gmra.mxu1 %vm207_vm3, %v1535_v8 }
0x12e2   :  { %2341 = vmatpush3.msra.mxu1 %v2506_v10  ;;  %2356 = vmatprep.mubr.msk.f32.mxu1 %vm2517_vm2, %v2516_v0  ;;  %v1845_v10 = vld [vmem:[%s3130_s6 + $0x8] sm:$0xff] }
0x12e3   :  { %2342 = vmatprep.subr.mxu1 %v2516_v0 }
0x12e4   :  { %2343 = vmatpush3.msra.mxu1 %v2507_v11  ;;  %v1844_v11 = vld [vmem:[%s3130_s6] sm:$0xff] }
0x12e5   :  { %2344 = vmatprep.subr.mxu1 %v2516_v0 }
0x12e6   :  { %2345 = vmatpush3.msra.mxu1 %v2508_v12  ;;  %v1539_v13 = vpop.permute.xlu1 %1538 }
0x12e7   :  { %2346 = vmatprep.subr.mxu1 %v2516_v0  ;;  %v1541_v14 = vsel %vm207_vm3, %v1535_v8, %v1539_v13  ;;  %v1846_v8 = vld [vmem:[%s3130_s6 + $0x10] sm:$0xff] }
0x12e8   :  { %2347 = vmatpush3.msra.mxu1 %v2509_v15  ;;  %2327 = vmatmul.mubr.msk.f32.vlgmr.msra.gmra.mxu0 %vm311_vm4, %v1541_v14 }
0x12e9   :  { %2348 = vmatprep.subr.mxu1 %v2516_v0  ;;  %2367 = vmatprep.mubr.msk.f32.mxu0 %vm2517_vm2, %v2516_v0 }
0x12ea   :  { %2349 = vmatpush3.msra.mxu1 %v2510_v16  ;;  %2360 = vmatpush3.msra.mxu0 %v1847_v46  ;;  %v1977_v16 = vld [vmem:[%s3131_s7] ss:$0 sm:$0xff] }
0x12eb   :  { %2350 = vmatprep.subr.mxu1 %v2516_v0  ;;  %2361 = vmatprep.subr.mxu0 %v2516_v0 }
0x12ec   :  { %2351 = vmatpush3.msra.mxu1 %v2511_v17  ;;  %2362 = vmatpush3.msra.mxu0 %v1846_v8 }
0x12ed   :  { %2352 = vmatprep.subr.mxu1 %v2516_v0  ;;  %2363 = vmatprep.subr.mxu0 %v2516_v0 }
0x12ee   :  { %2353 = vmatpush3.msra.mxu1 %v2512_v18  ;;  %2364 = vmatpush3.msra.mxu0 %v1845_v10 }
0x12ef   :  { %2354 = vmatprep.subr.mxu1 %v2516_v0  ;;  %2365 = vmatprep.subr.mxu0 %v2516_v0 }
0x12f0   :  { %2355 = vmatpush3.msra.mxu1 %v2513_v19  ;;  %2366 = vmatpush3.msra.mxu0 %v1844_v11 }
0x13a1   :  { %v1709_v22 = vpop.f32.mrf.mxu1 }
0x13a2   :  { %v1713_v47 = vadd.f32 %v1709_v22, %v188_v21 }
0x13a3   :  { %v2339_v23 = vpop.f32.mrf.mxu1 }
0x13a4   :  { %2478 = vtanh.f32 %v1713_v47  ;;  %v1974_v33 = vmul.f32 -1.442695, %v1713_v47 }
0x13a8   :  { %v1611_v24 = vpop.f32.mrf.mxu0 }
0x13a9   :  { %v1612_v25 = vadd.f32 %v2764_v51, %v1611_v24 }
0x13aa   :  { %v2328_v26 = vpop.f32.mrf.mxu0 }
0x13ab   :  { %2480 = vtanh.f32 %v1612_v25  ;;  %v1972_v35 = vmul.f32 -1.442695, %v1612_v25 }
0x13ac   :  { %2482 = vpow2.f32 %v1974_v33 }
0x13ad   :  { %2484 = vpow2.f32 %v1972_v35 }
0x13b1   :  { %v2479_v29 = vpop.eup %2478 }
0x13b2   :  { %1723 = vrot.lane.b32.xlu1 %v2479_v29, %s2518_s20 }
0x13b8   :  { %v2481_v31 = vpop.eup %2480 }
0x13b9   :  { %1624 = vrot.lane.b32.xlu0 %v2481_v31, %s2518_s20  ;;  %v2483_v48 = vpop.eup %2482 }
0x13ba   :  { %v1717_v36 = vadd.f32 1.0, %v2483_v48  ;;  %v2485_v27 = vpop.eup %2484 }
0x13bb   :  { %v1618_v28 = vadd.f32 1.0, %v2485_v27 }
0x13bc   :  { %2486 = vrcp.f32 %v1717_v36 }
0x13bd   :  { %2488 = vrcp.f32 %v1618_v28 }
0x13c9   :  { %v2487_v30 = vpop.eup %2486 }
0x13ca   :  { %v2489_v34 = vpop.eup %2488  ;;  %v1721_v40 = vmul.f32 %v2487_v30, %v3029_v6 }
0x13cb   :  { %v1622_v43 = vmul.f32 %v2489_v34, %v3033_v61 }
0x1424   :  { %v1724_v51 = vpop.permute.xlu1 %1723 }
0x1425   :  { %v1726_v32 = vmul.f32 %v2487_v30, %v1724_v51 }
0x1427   :  { %1728 = vrot.lane.b32.xlu1 %v1726_v32, %s2519_s21 }
0x142b   :  { %v1625_v37 = vpop.permute.xlu0 %1624 }
0x142c   :  { %v1627_v44 = vmul.f32 %v2489_v34, %v1625_v37 }
0x142e   :  { %1629 = vrot.lane.b32.xlu0 %v1627_v44, %s2519_s21 }
0x1499   :  { %v1729_v41 = vpop.permute.xlu1 %1728 }
0x149a   :  { %v1731_v42 = vadd.f32 %v1729_v41, %v1721_v40 }
0x149c   :  { %2490 = vtanh.f32 %v1731_v42 }
0x14a0   :  { %v1630_v38 = vpop.permute.xlu0 %1629 }
0x14a1   :  { %v1632_v49 = vadd.f32 %v1630_v38, %v1622_v43 }
0x14a3   :  { %2492 = vtanh.f32 %v1632_v49 }
0x14a9   :  { %v2491_v39 = vpop.eup %2490 }
0x14aa   :  { %1734 = vrot.lane.b32.xlu1 %v2491_v39, %s2518_s20 }
0x14b0   :  { %v2493_v52 = vpop.eup %2492 }
0x14b1   :  { %1635 = vrot.lane.b32.xlu0 %v2493_v52, %s2518_s20 }
0x151c   :  { %v1735_v9 = vpop.permute.xlu1 %1734 }
0x151d   :  { %v1737_v50 = vmul.f32 %v2487_v30, %v1735_v9 }
0x151f   :  { %1739 = vrot.lane.b32.xlu0 %v1737_v50, %s2519_s21 }
0x1523   :  { %v1636_v53 = vpop.permute.xlu0 %1635 }
0x1524   :  { %v1638_v54 = vmul.f32 %v2489_v34, %v1636_v53 }
0x1526   :  { %1743 = vrot.lane.b32.xlu1 %v1638_v54, %s2518_s20 }
0x1591   :  { %v1740_v45 = vpop.permute.xlu0 %1739 }
0x1598   :  { %v1744_v55 = vpop.permute.xlu1 %1743 }
0x1599   :  { %v1746_v56 = vsel %vm207_vm3, %v1740_v45, %v1744_v55 }
0x159a   :  { %2357 = vmatmul.mubr.msk.f32.vlgmr.msra.gmra.mxu1 %vm311_vm4, %v1746_v56 }
0x165a   :  { %v1816_v57 = vpop.f32.mrf.mxu1 }
0x165b   :  { %v1817_v59 = vadd.f32 %v2515_v58, %v1816_v57 }
0x165c   :  { %v2358_v2 = vpop.f32.mrf.mxu1 }
0x165d   :  { %2494 = vtanh.f32 %v1817_v59  ;;  %v1976_v6 = vmul.f32 -1.442695, %v1817_v59 }
0x165f   :  { %2496 = vpow2.f32 %v1976_v6 }
0x166a   :  { %v2495_v5 = vpop.eup %2494 }
0x166b   :  { %1829 = vrot.lane.b32.xlu0 %v2495_v5, %s2518_s20 }
0x166c   :  { %v2497_v60 = vpop.eup %2496 }
0x166d   :  { %v1823_v7 = vadd.f32 1.0, %v2497_v60 }
0x166f   :  { %2498 = vrcp.f32 %v1823_v7 }
0x167c   :  { %v2499_v61 = vpop.eup %2498 }
0x167d   :  { %v1827_v1 = vmul.f32 %v2499_v61, %v1632_v49 }
0x16dd   :  { %v1830_v62 = vpop.permute.xlu0 %1829 }
0x16de   :  { %v1832_v63 = vmul.f32 %v2499_v61, %v1830_v62 }
0x16e0   :  { %1834 = vrot.lane.b32.xlu1 %v1832_v63, %s2519_s21 }
0x1752   :  { %v1835_v3 = vpop.permute.xlu1 %1834 }
0x1753   :  { %v1837_v4 = vadd.f32 %v1835_v3, %v1827_v1 }
0x1755   :  { %2500 = vtanh.f32 %v1837_v4 }
0x1762   :  { %v2501_v12 = vpop.eup %2500 }
0x1763   :  { %1840 = vrot.lane.b32.xlu0 %v2501_v12, %s2518_s20 }
0x17d5   :  { %v1841_v13 = vpop.permute.xlu0 %1840 }
0x17d6   :  { %v1843_v14 = vmul.f32 %v2499_v61, %v1841_v13 }
0x17d8   :  { %1856 = vrot.lane.b32.xlu1 %v1843_v14, %s2519_s21 }
0x184a   :  { %v1857_v15 = vpop.permute.xlu1 %1856 }
0x184b   :  { %2368 = vmatmul.mubr.msk.f32.vlgmr.msra.gmra.mxu0 %vm207_vm3, %v1857_v15 }
0x190b   :  { %v1926_v17 = vpop.f32.mrf.mxu0 }
0x190c   :  { %v1927_v18 = vadd.f32 %v1977_v16, %v1926_v17 }
0x190d   :  { %v2369_v19 = vpop.f32.mrf.mxu0 }
0x190e   :  { %1930 = vst [vmem:[%s3132_s8] sm:$0xff] %v1927_v18 }

</bundles_post_ra>
